<compile_context>
chip_gen: v6e
topology: v6e:2x2x1
jax: 0.10.0
libtpu: 0.0.40
codegen_flags: <defaults>
</compile_context>

<pallas_src>
import functools

import jax
import jax.numpy as jnp
import numpy as np
from jax.experimental import pallas as pl
from jax.experimental.pallas import tpu as pltpu


# ----------------------------- config ---------------------------------------
class Config:
    n_enc_vocab = 16
    n_enc_seq = 8
    d_hidn = 32
    n_head = 2
    d_head = 16
    d_ff = 64
    n_layer = 2
    i_pad = 0
    layer_norm_epsilon = 1e-12


cfg = Config()


# ------------------------ sinusoid position table ----------------------------
def get_sinusoid_table(n_seq, d_hidn):
    pos = np.arange(n_seq)[:, None].astype(np.float64)
    i = np.arange(d_hidn)[None, :]
    angle = pos / np.power(10000.0, 2.0 * (i // 2) / d_hidn)
    table = np.zeros((n_seq, d_hidn), dtype=np.float64)
    table[:, 0::2] = np.sin(angle[:, 0::2])
    table[:, 1::2] = np.cos(angle[:, 1::2])
    return jnp.asarray(table, dtype=jnp.float32)


# ------------------------------ math helpers ----------------------------------
def _layer_norm(x, g, b, eps):
    mu = jnp.mean(x, axis=-1, keepdims=True)
    var = jnp.mean((x - mu) ** 2, axis=-1, keepdims=True)
    return (x - mu) * jax.lax.rsqrt(var + eps) * g + b


def _gelu_exact(x):
    # matches torch.nn.functional.gelu (erf form)
    return 0.5 * x * (1.0 + jax.lax.erf(x * (1.0 / np.sqrt(2.0))))


# ------------------------------ kernel ---------------------------------------
def encoder_kernel(
    x_ref, bias_ref,
    wq_ref, bq_ref, wk_ref, bk_ref, wv_ref, bv_ref, wo_ref, bo_ref,
    g1_ref, be1_ref, w1_ref, bf1_ref, w2_ref, bf2_ref, g2_ref, be2_ref,
    out_ref, attn_ref,
    *, n_layer, n_head, batch, seq, eps,
):
    # ---- hoisted loads (constant across layers / heads / batches) -----------
    x = x_ref[...]                                   # (B*S, D) f32
    biases = [bias_ref[b] for b in range(batch)]     # B x (S, S) additive bias
    wq = [wq_ref[h] for h in range(n_head)]          # H x (D, Dh)  (scale folded in)
    bq = [bq_ref[h] for h in range(n_head)]          # H x (1, Dh)
    wk = [wk_ref[h] for h in range(n_head)]
    bk = [bk_ref[h] for h in range(n_head)]
    wv = [wv_ref[h] for h in range(n_head)]
    bv = [bv_ref[h] for h in range(n_head)]
    wo = [wo_ref[h] for h in range(n_head)]          # H x (Dh, D)
    bo = bo_ref[...]                                 # (1, D)
    g1, be1 = g1_ref[...], be1_ref[...]
    g2, be2 = g2_ref[...], be2_ref[...]
    w1, bf1 = w1_ref[...], bf1_ref[...]
    w2, bf2 = w2_ref[...], bf2_ref[...]

    score_dims = (((1,), (1,)), ((), ()))            # contract last dims (no .T relayout)

    # layers share weights (nn.ModuleList([EncoderLayer(config)] * n_layer))
    for l in range(n_layer):
        # --- QKV projections: full (B*S, D) rows at once, per head ------------
        qs = [jnp.dot(x, wq[h], preferred_element_type=jnp.float32) + bq[h]
              for h in range(n_head)]
        ks = [jnp.dot(x, wk[h], preferred_element_type=jnp.float32) + bk[h]
              for h in range(n_head)]
        vs = [jnp.dot(x, wv[h], preferred_element_type=jnp.float32) + bv[h]
              for h in range(n_head)]

        # --- scaled-dot-product attention per (batch, head) -------------------
        mha_rows = []
        for b in range(batch):
            r0, r1 = b * seq, (b + 1) * seq          # static, sublane-aligned (S=8)
            acc_b = None
            for h in range(n_head):
                qh = qs[h][r0:r1]                    # (S, Dh)
                kh = ks[h][r0:r1]
                vh = vs[h][r0:r1]
                s = jax.lax.dot_general(qh, kh, score_dims,
                                        preferred_element_type=jnp.float32)
                s = s + biases[b]                    # additive pad bias (0 / -1e9)
                s = s - jnp.max(s, axis=-1, keepdims=True)
                e = jnp.exp(s)
                p = e * pl.reciprocal(jnp.sum(e, axis=-1, keepdims=True), approx=True)
                attn_ref[l, b, h] = p                # (S, S) attention probs
                ctx = jnp.dot(p, vh, preferred_element_type=jnp.float32)         # (S, Dh)
                part = jnp.dot(ctx, wo[h], preferred_element_type=jnp.float32)   # (S, D)
                acc_b = part if acc_b is None else acc_b + part
            mha_rows.append(acc_b)
        mha = jnp.concatenate(mha_rows, axis=0) + bo  # (B*S, D)

        # --- residual + LayerNorm 1 -------------------------------------------
        res1 = mha + x
        ln1 = _layer_norm(res1, g1, be1, eps)

        # --- position-wise FFN (Conv1d k=1 == matmul over hidden) -------------
        h1 = jnp.dot(ln1, w1, preferred_element_type=jnp.float32) + bf1
        h1 = _gelu_exact(h1)
        ffn = jnp.dot(h1, w2, preferred_element_type=jnp.float32) + bf2

        # --- residual + LayerNorm 2 -------------------------------------------
        x = _layer_norm(ffn + ln1, g2, be2, eps)

    out_ref[...] = x


# ------------------------------ param prep ------------------------------------
def prepare_kernel_params(params, config):
    """One-time transform of torch-layout params to kernel layout.

    Splits QKV/O weights per head and folds 1/sqrt(d_head) into W_Q/b_Q.
    """
    (wq, bq, wk, bk, wv, bv, wo, bo,
     g1, be1, w1, bf1, w2, bf2, g2, be2) = params
    H, Dh, D = config.n_head, config.d_head, config.d_hidn
    scale = jnp.float32(1.0 / np.sqrt(Dh))

    def split_in(w, b, s=None):
        wh = jnp.transpose(w.reshape(D, H, Dh), (1, 0, 2))    # (H, D, Dh)
        bh = jnp.transpose(b.reshape(1, H, Dh), (1, 0, 2))    # (H, 1, Dh)
        if s is not None:
            wh, bh = wh * s, bh * s
        return wh.astype(jnp.float32), bh.astype(jnp.float32)

    wq_h, bq_h = split_in(wq, bq, scale)
    wk_h, bk_h = split_in(wk, bk)
    wv_h, bv_h = split_in(wv, bv)
    wo_h = wo.reshape(H, Dh, D).astype(jnp.float32)            # (H, Dh, D)

    return (wq_h, bq_h, wk_h, bk_h, wv_h, bv_h, wo_h, bo,
            g1, be1, w1, bf1, w2, bf2, g2, be2)


# ------------------------------ wrapper ---------------------------------------
def encoder_forward(ids, enc_emb, pos_table, kernel_params, config):
    """Full Encoder.forward: embeddings + n_layer shared-weight EncoderLayers,
    fused into a single pallas_call."""
    B, S = ids.shape
    D, H, Dh, Dff, L = (config.d_hidn, config.n_head, config.d_head,
                        config.d_ff, config.n_layer)

    # positions = arange(S)+1, zeroed where input is pad  (JAX glue: gathers)
    positions = jnp.broadcast_to(jnp.arange(1, S + 1, dtype=ids.dtype)[None, :], (B, S))
    pad = ids == config.i_pad
    positions = jnp.where(pad, 0, positions)

    x = (enc_emb[ids] + pos_table[positions]).astype(jnp.float32)   # (B, S, D)
    x2 = x.reshape(B * S, D)                                        # flatten rows

    # additive attention bias: -1e9 where the key position is pad
    mask_bias = jnp.broadcast_to(
        pad[:, None, :].astype(jnp.float32) * jnp.float32(-1e9), (B, S, S))

    def full(shape):
        nd = len(shape)
        return pl.BlockSpec(shape, lambda i, nd=nd: (0,) * nd)

    kernel = functools.partial(
        encoder_kernel, n_layer=L, n_head=H, batch=B, seq=S,
        eps=float(config.layer_norm_epsilon),
    )

    out2, attn = pl.pallas_call(
        kernel,
        out_shape=(
            jax.ShapeDtypeStruct((B * S, D), jnp.float32),
            jax.ShapeDtypeStruct((L, B, H, S, S), jnp.float32),
        ),
        grid=(1,),
        in_specs=[
            full((B * S, D)),                    # x (flattened)
            full((B, S, S)),                     # additive pad bias
            full((H, D, Dh)), full((H, 1, Dh)),  # W_Q (scaled), b_Q (scaled)
            full((H, D, Dh)), full((H, 1, Dh)),  # W_K, b_K
            full((H, D, Dh)), full((H, 1, Dh)),  # W_V, b_V
            full((H, Dh, D)), full((1, D)),      # W_O (per-head), b_O
            full((1, D)), full((1, D)),          # ln1 gamma, beta
            full((D, Dff)), full((1, Dff)),      # ffn conv1 (1x1)
            full((Dff, D)), full((1, D)),        # ffn conv2 (1x1)
            full((1, D)), full((1, D)),          # ln2 gamma, beta
        ],
        out_specs=(
            full((B * S, D)),
            full((L, B, H, S, S)),
        ),
        compiler_params=pltpu.CompilerParams(dimension_semantics=("parallel",)),
    )(x2, mask_bias, *kernel_params)

    out = out2.reshape(B, S, D)
    attn_probs = [attn[l] for l in range(L)]
    return out, attn_probs


# ------------------------------ pure-JAX reference -----------------------------
def encoder_reference(ids, enc_emb, pos_table, params, config):
    (wq, bq, wk, bk, wv, bv, wo, bo,
     g1, be1, w1, bf1, w2, bf2, g2, be2) = params
    B, S = ids.shape
    D, H, Dh = config.d_hidn, config.n_head, config.d_head
    eps = config.layer_norm_epsilon

    positions = jnp.broadcast_to(jnp.arange(1, S + 1, dtype=ids.dtype)[None, :], (B, S))
    pad = ids == config.i_pad
    positions = jnp.where(pad, 0, positions)
    x = enc_emb[ids] + pos_table[positions]
    mask = jnp.broadcast_to(pad[:, None, :], (B, S, S))

    def ln(v, g, b):
        mu = jnp.mean(v, -1, keepdims=True)
        var = jnp.mean((v - mu) ** 2, -1, keepdims=True)
        return (v - mu) / jnp.sqrt(var + eps) * g + b

    attns = []
    for _ in range(config.n_layer):
        q = (x @ wq + bq).reshape(B, S, H, Dh).transpose(0, 2, 1, 3)
        k = (x @ wk + bk).reshape(B, S, H, Dh).transpose(0, 2, 1, 3)
        v = (x @ wv + bv).reshape(B, S, H, Dh).transpose(0, 2, 1, 3)
        s = jnp.einsum("bhqd,bhkd->bhqk", q, k) / np.sqrt(Dh)
        s = jnp.where(mask[:, None, :, :], -1e9, s)
        p = jax.nn.softmax(s, axis=-1)
        attns.append(p)
        ctx = jnp.einsum("bhqk,bhkd->bhqd", p, v).transpose(0, 2, 1, 3).reshape(B, S, H * Dh)
        mha = ctx @ wo + bo
        ln1_ = ln(mha + x, g1, be1)
        h1 = ln1_ @ w1 + bf1
        h1 = 0.5 * h1 * (1.0 + jax.lax.erf(h1 / np.sqrt(2.0)))
        ffn = h1 @ w2 + bf2
        x = ln(ffn + ln1_, g2, be2)
    return x, attns


# ------------------------------ main ------------------------------------------
if __name__ == "__main__":
    B, S = 2, cfg.n_enc_seq
    D, H, Dh, Dff = cfg.d_hidn, cfg.n_head, cfg.d_head, cfg.d_ff

    key = jax.random.PRNGKey(0)
    ks = jax.random.split(key, 16)

    # token ids (long in torch -> int32 here), with trailing pads in sequence 1
    ids = jax.random.randint(ks[0], (B, S), 1, cfg.n_enc_vocab, dtype=jnp.int32)
    ids = ids.at[1, -3:].set(cfg.i_pad)

    def nrm(k, shape, s=0.05):
        return (s * jax.random.normal(k, shape)).astype(jnp.float32)

    enc_emb = nrm(ks[1], (cfg.n_enc_vocab, D), 0.02)
    pos_table = get_sinusoid_table(cfg.n_enc_seq + 1, D)

    # torch-layout params (same as nn.Linear / nn.Conv1d(k=1) weights, transposed)
    params = (
        nrm(ks[2], (D, H * Dh)),  nrm(ks[3], (1, H * Dh), 0.01),   # W_Q, b_Q
        nrm(ks[4], (D, H * Dh)),  nrm(ks[5], (1, H * Dh), 0.01),   # W_K, b_K
        nrm(ks[6], (D, H * Dh)),  nrm(ks[7], (1, H * Dh), 0.01),   # W_V, b_V
        nrm(ks[8], (H * Dh, D)),  nrm(ks[9], (1, D), 0.01),        # W_O, b_O
        jnp.ones((1, D), jnp.float32), jnp.zeros((1, D), jnp.float32),  # ln1
        nrm(ks[10], (D, Dff)),    nrm(ks[11], (1, Dff), 0.01),     # ffn conv1 (1x1)
        nrm(ks[12], (Dff, D)),    nrm(ks[13], (1, D), 0.01),       # ffn conv2 (1x1)
        jnp.ones((1, D), jnp.float32), jnp.zeros((1, D), jnp.float32),  # ln2
    )

    # one-time param transform (head split + scale folding)
    kernel_params = prepare_kernel_params(params, cfg)

    out, attn_probs = encoder_forward(ids, enc_emb, pos_table, kernel_params, cfg)
    jax.block_until_ready((out, attn_probs))

    assert out.shape == (B, S, D)
    assert len(attn_probs) == cfg.n_layer
    assert attn_probs[0].shape == (B, H, S, S)

    # correctness check against a pure-JAX reference (approx. reciprocal in the
    # kernel softmax -> generous tolerance)
    ref_out, ref_attns = encoder_reference(ids, enc_emb, pos_table, params, cfg)
    np.testing.assert_allclose(np.asarray(out), np.asarray(ref_out), rtol=5e-3, atol=5e-3)
    for l in range(cfg.n_layer):
        np.testing.assert_allclose(np.asarray(attn_probs[l]), np.asarray(ref_attns[l]),
                                   rtol=5e-3, atol=5e-3)

    print("KERNEL_OK")
</pallas_src>

<mosaic_0001>
module attributes {stable_mosaic.version = 11 : i64} {
  func.func @encoder_kernel(%arg0: i32, %arg1: memref<16x32xf32, #tpu.memory_space<vmem>>, %arg2: memref<2x8x8xf32, #tpu.memory_space<vmem>>, %arg3: memref<2x32x16xf32, #tpu.memory_space<vmem>>, %arg4: memref<2x1x16xf32, #tpu.memory_space<vmem>>, %arg5: memref<2x32x16xf32, #tpu.memory_space<vmem>>, %arg6: memref<2x1x16xf32, #tpu.memory_space<vmem>>, %arg7: memref<2x32x16xf32, #tpu.memory_space<vmem>>, %arg8: memref<2x1x16xf32, #tpu.memory_space<vmem>>, %arg9: memref<2x16x32xf32, #tpu.memory_space<vmem>>, %arg10: memref<1x32xf32, #tpu.memory_space<vmem>>, %arg11: memref<1x32xf32, #tpu.memory_space<vmem>>, %arg12: memref<1x32xf32, #tpu.memory_space<vmem>>, %arg13: memref<32x64xf32, #tpu.memory_space<vmem>>, %arg14: memref<1x64xf32, #tpu.memory_space<vmem>>, %arg15: memref<64x32xf32, #tpu.memory_space<vmem>>, %arg16: memref<1x32xf32, #tpu.memory_space<vmem>>, %arg17: memref<1x32xf32, #tpu.memory_space<vmem>>, %arg18: memref<1x32xf32, #tpu.memory_space<vmem>>, %arg19: memref<16x32xf32, #tpu.memory_space<vmem>>, %arg20: memref<2x2x2x8x8xf32, #tpu.memory_space<vmem>>) attributes {dimension_semantics = [#tpu.dimension_semantics<parallel>], iteration_bounds = array<i64: 1>, scalar_prefetch = 0 : i64, scratch_operands = 0 : i64, tpu.core_type = #tpu.core_type<tc>, window_params = [{pipeline_mode = #tpu.pipeline_mode<synchronous>, transform_indices = @transform_0, window_bounds = array<i64: 16, 32>}, {pipeline_mode = #tpu.pipeline_mode<synchronous>, transform_indices = @transform_1, window_bounds = array<i64: 2, 8, 8>}, {pipeline_mode = #tpu.pipeline_mode<synchronous>, transform_indices = @transform_2, window_bounds = array<i64: 2, 32, 16>}, {pipeline_mode = #tpu.pipeline_mode<synchronous>, transform_indices = @transform_3, window_bounds = array<i64: 2, 1, 16>}, {pipeline_mode = #tpu.pipeline_mode<synchronous>, transform_indices = @transform_4, window_bounds = array<i64: 2, 32, 16>}, {pipeline_mode = #tpu.pipeline_mode<synchronous>, transform_indices = @transform_5, window_bounds = array<i64: 2, 1, 16>}, {pipeline_mode = #tpu.pipeline_mode<synchronous>, transform_indices = @transform_6, window_bounds = array<i64: 2, 32, 16>}, {pipeline_mode = #tpu.pipeline_mode<synchronous>, transform_indices = @transform_7, window_bounds = array<i64: 2, 1, 16>}, {pipeline_mode = #tpu.pipeline_mode<synchronous>, transform_indices = @transform_8, window_bounds = array<i64: 2, 16, 32>}, {pipeline_mode = #tpu.pipeline_mode<synchronous>, transform_indices = @transform_9, window_bounds = array<i64: 1, 32>}, {pipeline_mode = #tpu.pipeline_mode<synchronous>, transform_indices = @transform_10, window_bounds = array<i64: 1, 32>}, {pipeline_mode = #tpu.pipeline_mode<synchronous>, transform_indices = @transform_11, window_bounds = array<i64: 1, 32>}, {pipeline_mode = #tpu.pipeline_mode<synchronous>, transform_indices = @transform_12, window_bounds = array<i64: 32, 64>}, {pipeline_mode = #tpu.pipeline_mode<synchronous>, transform_indices = @transform_13, window_bounds = array<i64: 1, 64>}, {pipeline_mode = #tpu.pipeline_mode<synchronous>, transform_indices = @transform_14, window_bounds = array<i64: 64, 32>}, {pipeline_mode = #tpu.pipeline_mode<synchronous>, transform_indices = @transform_15, window_bounds = array<i64: 1, 32>}, {pipeline_mode = #tpu.pipeline_mode<synchronous>, transform_indices = @transform_16, window_bounds = array<i64: 1, 32>}, {pipeline_mode = #tpu.pipeline_mode<synchronous>, transform_indices = @transform_17, window_bounds = array<i64: 1, 32>}, {pipeline_mode = #tpu.pipeline_mode<synchronous>, transform_indices = @transform_18, window_bounds = array<i64: 16, 32>}, {pipeline_mode = #tpu.pipeline_mode<synchronous>, transform_indices = @transform_19, window_bounds = array<i64: 2, 2, 2, 8, 8>}]} {
    %c0 = arith.constant 0 : index
    %c0_0 = arith.constant 0 : index
    %0 = vector.load %arg1[%c0, %c0_0] : memref<16x32xf32, #tpu.memory_space<vmem>>, vector<16x32xf32>
    %c0_1 = arith.constant 0 : index
    %c0_2 = arith.constant 0 : index
    %c0_3 = arith.constant 0 : index
    %1 = vector.load %arg2[%c0_1, %c0_2, %c0_3] : memref<2x8x8xf32, #tpu.memory_space<vmem>>, vector<1x8x8xf32>
    %2 = vector.shape_cast %1 : vector<1x8x8xf32> to vector<8x8xf32>
    %c1 = arith.constant 1 : index
    %c0_4 = arith.constant 0 : index
    %c0_5 = arith.constant 0 : index
    %3 = vector.load %arg2[%c1, %c0_4, %c0_5] : memref<2x8x8xf32, #tpu.memory_space<vmem>>, vector<1x8x8xf32>
    %4 = vector.shape_cast %3 : vector<1x8x8xf32> to vector<8x8xf32>
    %c0_6 = arith.constant 0 : index
    %c0_7 = arith.constant 0 : index
    %c0_8 = arith.constant 0 : index
    %5 = vector.load %arg3[%c0_6, %c0_7, %c0_8] : memref<2x32x16xf32, #tpu.memory_space<vmem>>, vector<1x32x16xf32>
    %6 = vector.shape_cast %5 : vector<1x32x16xf32> to vector<32x16xf32>
    %c1_9 = arith.constant 1 : index
    %c0_10 = arith.constant 0 : index
    %c0_11 = arith.constant 0 : index
    %7 = vector.load %arg3[%c1_9, %c0_10, %c0_11] : memref<2x32x16xf32, #tpu.memory_space<vmem>>, vector<1x32x16xf32>
    %8 = vector.shape_cast %7 : vector<1x32x16xf32> to vector<32x16xf32>
    %c0_12 = arith.constant 0 : index
    %c0_13 = arith.constant 0 : index
    %c0_14 = arith.constant 0 : index
    %9 = vector.load %arg4[%c0_12, %c0_13, %c0_14] : memref<2x1x16xf32, #tpu.memory_space<vmem>>, vector<1x1x16xf32>
    %10 = vector.shape_cast %9 : vector<1x1x16xf32> to vector<1x16xf32>
    %c1_15 = arith.constant 1 : index
    %c0_16 = arith.constant 0 : index
    %c0_17 = arith.constant 0 : index
    %11 = vector.load %arg4[%c1_15, %c0_16, %c0_17] : memref<2x1x16xf32, #tpu.memory_space<vmem>>, vector<1x1x16xf32>
    %12 = vector.shape_cast %11 : vector<1x1x16xf32> to vector<1x16xf32>
    %c0_18 = arith.constant 0 : index
    %c0_19 = arith.constant 0 : index
    %c0_20 = arith.constant 0 : index
    %13 = vector.load %arg5[%c0_18, %c0_19, %c0_20] : memref<2x32x16xf32, #tpu.memory_space<vmem>>, vector<1x32x16xf32>
    %14 = vector.shape_cast %13 : vector<1x32x16xf32> to vector<32x16xf32>
    %c1_21 = arith.constant 1 : index
    %c0_22 = arith.constant 0 : index
    %c0_23 = arith.constant 0 : index
    %15 = vector.load %arg5[%c1_21, %c0_22, %c0_23] : memref<2x32x16xf32, #tpu.memory_space<vmem>>, vector<1x32x16xf32>
    %16 = vector.shape_cast %15 : vector<1x32x16xf32> to vector<32x16xf32>
    %c0_24 = arith.constant 0 : index
    %c0_25 = arith.constant 0 : index
    %c0_26 = arith.constant 0 : index
    %17 = vector.load %arg6[%c0_24, %c0_25, %c0_26] : memref<2x1x16xf32, #tpu.memory_space<vmem>>, vector<1x1x16xf32>
    %18 = vector.shape_cast %17 : vector<1x1x16xf32> to vector<1x16xf32>
    %c1_27 = arith.constant 1 : index
    %c0_28 = arith.constant 0 : index
    %c0_29 = arith.constant 0 : index
    %19 = vector.load %arg6[%c1_27, %c0_28, %c0_29] : memref<2x1x16xf32, #tpu.memory_space<vmem>>, vector<1x1x16xf32>
    %20 = vector.shape_cast %19 : vector<1x1x16xf32> to vector<1x16xf32>
    %c0_30 = arith.constant 0 : index
    %c0_31 = arith.constant 0 : index
    %c0_32 = arith.constant 0 : index
    %21 = vector.load %arg7[%c0_30, %c0_31, %c0_32] : memref<2x32x16xf32, #tpu.memory_space<vmem>>, vector<1x32x16xf32>
    %22 = vector.shape_cast %21 : vector<1x32x16xf32> to vector<32x16xf32>
    %c1_33 = arith.constant 1 : index
    %c0_34 = arith.constant 0 : index
    %c0_35 = arith.constant 0 : index
    %23 = vector.load %arg7[%c1_33, %c0_34, %c0_35] : memref<2x32x16xf32, #tpu.memory_space<vmem>>, vector<1x32x16xf32>
    %24 = vector.shape_cast %23 : vector<1x32x16xf32> to vector<32x16xf32>
    %c0_36 = arith.constant 0 : index
    %c0_37 = arith.constant 0 : index
    %c0_38 = arith.constant 0 : index
    %25 = vector.load %arg8[%c0_36, %c0_37, %c0_38] : memref<2x1x16xf32, #tpu.memory_space<vmem>>, vector<1x1x16xf32>
    %26 = vector.shape_cast %25 : vector<1x1x16xf32> to vector<1x16xf32>
    %c1_39 = arith.constant 1 : index
    %c0_40 = arith.constant 0 : index
    %c0_41 = arith.constant 0 : index
    %27 = vector.load %arg8[%c1_39, %c0_40, %c0_41] : memref<2x1x16xf32, #tpu.memory_space<vmem>>, vector<1x1x16xf32>
    %28 = vector.shape_cast %27 : vector<1x1x16xf32> to vector<1x16xf32>
    %c0_42 = arith.constant 0 : index
    %c0_43 = arith.constant 0 : index
    %c0_44 = arith.constant 0 : index
    %29 = vector.load %arg9[%c0_42, %c0_43, %c0_44] : memref<2x16x32xf32, #tpu.memory_space<vmem>>, vector<1x16x32xf32>
    %30 = vector.shape_cast %29 : vector<1x16x32xf32> to vector<16x32xf32>
    %c1_45 = arith.constant 1 : index
    %c0_46 = arith.constant 0 : index
    %c0_47 = arith.constant 0 : index
    %31 = vector.load %arg9[%c1_45, %c0_46, %c0_47] : memref<2x16x32xf32, #tpu.memory_space<vmem>>, vector<1x16x32xf32>
    %32 = vector.shape_cast %31 : vector<1x16x32xf32> to vector<16x32xf32>
    %c0_48 = arith.constant 0 : index
    %c0_49 = arith.constant 0 : index
    %33 = vector.load %arg10[%c0_48, %c0_49] : memref<1x32xf32, #tpu.memory_space<vmem>>, vector<1x32xf32>
    %c0_50 = arith.constant 0 : index
    %c0_51 = arith.constant 0 : index
    %34 = vector.load %arg11[%c0_50, %c0_51] : memref<1x32xf32, #tpu.memory_space<vmem>>, vector<1x32xf32>
    %c0_52 = arith.constant 0 : index
    %c0_53 = arith.constant 0 : index
    %35 = vector.load %arg12[%c0_52, %c0_53] : memref<1x32xf32, #tpu.memory_space<vmem>>, vector<1x32xf32>
    %c0_54 = arith.constant 0 : index
    %c0_55 = arith.constant 0 : index
    %36 = vector.load %arg17[%c0_54, %c0_55] : memref<1x32xf32, #tpu.memory_space<vmem>>, vector<1x32xf32>
    %c0_56 = arith.constant 0 : index
    %c0_57 = arith.constant 0 : index
    %37 = vector.load %arg18[%c0_56, %c0_57] : memref<1x32xf32, #tpu.memory_space<vmem>>, vector<1x32xf32>
    %c0_58 = arith.constant 0 : index
    %c0_59 = arith.constant 0 : index
    %38 = vector.load %arg13[%c0_58, %c0_59] : memref<32x64xf32, #tpu.memory_space<vmem>>, vector<32x64xf32>
    %c0_60 = arith.constant 0 : index
    %c0_61 = arith.constant 0 : index
    %39 = vector.load %arg14[%c0_60, %c0_61] : memref<1x64xf32, #tpu.memory_space<vmem>>, vector<1x64xf32>
    %c0_62 = arith.constant 0 : index
    %c0_63 = arith.constant 0 : index
    %40 = vector.load %arg15[%c0_62, %c0_63] : memref<64x32xf32, #tpu.memory_space<vmem>>, vector<64x32xf32>
    %c0_64 = arith.constant 0 : index
    %c0_65 = arith.constant 0 : index
    %41 = vector.load %arg16[%c0_64, %c0_65] : memref<1x32xf32, #tpu.memory_space<vmem>>, vector<1x32xf32>
    %cst = arith.constant dense<0.000000e+00> : vector<16x16xf32>
    %42 = tpu.matmul %0, %6, %cst {dimension_numbers = #tpu.dot_dimension_numbers<[1], [0], [0], [1], [0, 0, 1, 1], [], []>} : vector<16x32xf32>, vector<32x16xf32>, vector<16x16xf32> -> vector<16x16xf32>
    %43 = vector.broadcast %10 : vector<1x16xf32> to vector<16x16xf32>
    %44 = arith.addf %42, %43 : vector<16x16xf32>
    %cst_66 = arith.constant dense<0.000000e+00> : vector<16x16xf32>
    %45 = tpu.matmul %0, %8, %cst_66 {dimension_numbers = #tpu.dot_dimension_numbers<[1], [0], [0], [1], [0, 0, 1, 1], [], []>} : vector<16x32xf32>, vector<32x16xf32>, vector<16x16xf32> -> vector<16x16xf32>
    %46 = vector.broadcast %12 : vector<1x16xf32> to vector<16x16xf32>
    %47 = arith.addf %45, %46 : vector<16x16xf32>
    %cst_67 = arith.constant dense<0.000000e+00> : vector<16x16xf32>
    %48 = tpu.matmul %0, %14, %cst_67 {dimension_numbers = #tpu.dot_dimension_numbers<[1], [0], [0], [1], [0, 0, 1, 1], [], []>} : vector<16x32xf32>, vector<32x16xf32>, vector<16x16xf32> -> vector<16x16xf32>
    %49 = vector.broadcast %18 : vector<1x16xf32> to vector<16x16xf32>
    %50 = arith.addf %48, %49 : vector<16x16xf32>
    %cst_68 = arith.constant dense<0.000000e+00> : vector<16x16xf32>
    %51 = tpu.matmul %0, %16, %cst_68 {dimension_numbers = #tpu.dot_dimension_numbers<[1], [0], [0], [1], [0, 0, 1, 1], [], []>} : vector<16x32xf32>, vector<32x16xf32>, vector<16x16xf32> -> vector<16x16xf32>
    %52 = vector.broadcast %20 : vector<1x16xf32> to vector<16x16xf32>
    %53 = arith.addf %51, %52 : vector<16x16xf32>
    %cst_69 = arith.constant dense<0.000000e+00> : vector<16x16xf32>
    %54 = tpu.matmul %0, %22, %cst_69 {dimension_numbers = #tpu.dot_dimension_numbers<[1], [0], [0], [1], [0, 0, 1, 1], [], []>} : vector<16x32xf32>, vector<32x16xf32>, vector<16x16xf32> -> vector<16x16xf32>
    %55 = vector.broadcast %26 : vector<1x16xf32> to vector<16x16xf32>
    %56 = arith.addf %54, %55 : vector<16x16xf32>
    %cst_70 = arith.constant dense<0.000000e+00> : vector<16x16xf32>
    %57 = tpu.matmul %0, %24, %cst_70 {dimension_numbers = #tpu.dot_dimension_numbers<[1], [0], [0], [1], [0, 0, 1, 1], [], []>} : vector<16x32xf32>, vector<32x16xf32>, vector<16x16xf32> -> vector<16x16xf32>
    %58 = vector.broadcast %28 : vector<1x16xf32> to vector<16x16xf32>
    %59 = arith.addf %57, %58 : vector<16x16xf32>
    %60 = vector.extract_strided_slice %44 {offsets = [0, 0], sizes = [8, 16], strides = [1, 1]} : vector<16x16xf32> to vector<8x16xf32>
    %61 = vector.extract_strided_slice %50 {offsets = [0, 0], sizes = [8, 16], strides = [1, 1]} : vector<16x16xf32> to vector<8x16xf32>
    %62 = vector.extract_strided_slice %56 {offsets = [0, 0], sizes = [8, 16], strides = [1, 1]} : vector<16x16xf32> to vector<8x16xf32>
    %cst_71 = arith.constant dense<0.000000e+00> : vector<8x8xf32>
    %63 = tpu.matmul %60, %61, %cst_71 {dimension_numbers = #tpu.dot_dimension_numbers<[1], [1], [0], [0], [0, 0, 1, 0], [], []>} : vector<8x16xf32>, vector<8x16xf32>, vector<8x8xf32> -> vector<8x8xf32>
    %64 = arith.addf %63, %2 : vector<8x8xf32>
    %cst_72 = arith.constant dense<0xFF800000> : vector<8xf32>
    %65 = vector.multi_reduction <maximumf>, %64, %cst_72 [1] : vector<8x8xf32> to vector<8xf32>
    %66 = vector.shape_cast %65 : vector<8xf32> to vector<8x1xf32>
    %67 = vector.broadcast %66 : vector<8x1xf32> to vector<8x8xf32>
    %68 = arith.subf %64, %67 : vector<8x8xf32>
    %69 = math.exp %68 : vector<8x8xf32>
    %cst_73 = arith.constant dense<0.000000e+00> : vector<8xf32>
    %70 = vector.multi_reduction <add>, %69, %cst_73 [1] : vector<8x8xf32> to vector<8xf32>
    %71 = vector.shape_cast %70 : vector<8xf32> to vector<8x1xf32>
    %72 = tpu.reciprocal %71 {approx = true} : vector<8x1xf32> -> vector<8x1xf32>
    %73 = vector.broadcast %72 : vector<8x1xf32> to vector<8x8xf32>
    %74 = arith.mulf %69, %73 : vector<8x8xf32>
    %c0_74 = arith.constant 0 : index
    %c0_75 = arith.constant 0 : index
    %c0_76 = arith.constant 0 : index
    %c0_77 = arith.constant 0 : index
    %c0_78 = arith.constant 0 : index
    %75 = vector.load %arg20[%c0_74, %c0_75, %c0_76, %c0_77, %c0_78] : memref<2x2x2x8x8xf32, #tpu.memory_space<vmem>>, vector<1x1x1x8x8xf32>
    %76 = vector.shape_cast %75 : vector<1x1x1x8x8xf32> to vector<8x8xf32>
    %77 = vector.shape_cast %74 : vector<8x8xf32> to vector<1x1x1x8x8xf32>
    tpu.vector_store %arg20[%c0_74, %c0_75, %c0_76, %c0_77, %c0_78], %77 {strides = array<i32>} : memref<2x2x2x8x8xf32, #tpu.memory_space<vmem>>, vector<1x1x1x8x8xf32>,
    %cst_79 = arith.constant dense<0.000000e+00> : vector<8x16xf32>
    %78 = tpu.matmul %74, %62, %cst_79 {dimension_numbers = #tpu.dot_dimension_numbers<[1], [0], [0], [1], [0, 0, 1, 1], [], []>} : vector<8x8xf32>, vector<8x16xf32>, vector<8x16xf32> -> vector<8x16xf32>
    %cst_80 = arith.constant dense<0.000000e+00> : vector<8x32xf32>
    %79 = tpu.matmul %78, %30, %cst_80 {dimension_numbers = #tpu.dot_dimension_numbers<[1], [0], [0], [1], [0, 0, 1, 1], [], []>} : vector<8x16xf32>, vector<16x32xf32>, vector<8x32xf32> -> vector<8x32xf32>
    %80 = vector.extract_strided_slice %47 {offsets = [0, 0], sizes = [8, 16], strides = [1, 1]} : vector<16x16xf32> to vector<8x16xf32>
    %81 = vector.extract_strided_slice %53 {offsets = [0, 0], sizes = [8, 16], strides = [1, 1]} : vector<16x16xf32> to vector<8x16xf32>
    %82 = vector.extract_strided_slice %59 {offsets = [0, 0], sizes = [8, 16], strides = [1, 1]} : vector<16x16xf32> to vector<8x16xf32>
    %cst_81 = arith.constant dense<0.000000e+00> : vector<8x8xf32>
    %83 = tpu.matmul %80, %81, %cst_81 {dimension_numbers = #tpu.dot_dimension_numbers<[1], [1], [0], [0], [0, 0, 1, 0], [], []>} : vector<8x16xf32>, vector<8x16xf32>, vector<8x8xf32> -> vector<8x8xf32>
    %84 = arith.addf %83, %2 : vector<8x8xf32>
    %cst_82 = arith.constant dense<0xFF800000> : vector<8xf32>
    %85 = vector.multi_reduction <maximumf>, %84, %cst_82 [1] : vector<8x8xf32> to vector<8xf32>
    %86 = vector.shape_cast %85 : vector<8xf32> to vector<8x1xf32>
    %87 = vector.broadcast %86 : vector<8x1xf32> to vector<8x8xf32>
    %88 = arith.subf %84, %87 : vector<8x8xf32>
    %89 = math.exp %88 : vector<8x8xf32>
    %cst_83 = arith.constant dense<0.000000e+00> : vector<8xf32>
    %90 = vector.multi_reduction <add>, %89, %cst_83 [1] : vector<8x8xf32> to vector<8xf32>
    %91 = vector.shape_cast %90 : vector<8xf32> to vector<8x1xf32>
    %92 = tpu.reciprocal %91 {approx = true} : vector<8x1xf32> -> vector<8x1xf32>
    %93 = vector.broadcast %92 : vector<8x1xf32> to vector<8x8xf32>
    %94 = arith.mulf %89, %93 : vector<8x8xf32>
    %c0_84 = arith.constant 0 : index
    %c0_85 = arith.constant 0 : index
    %c1_86 = arith.constant 1 : index
    %c0_87 = arith.constant 0 : index
    %c0_88 = arith.constant 0 : index
    %95 = vector.load %arg20[%c0_84, %c0_85, %c1_86, %c0_87, %c0_88] : memref<2x2x2x8x8xf32, #tpu.memory_space<vmem>>, vector<1x1x1x8x8xf32>
    %96 = vector.shape_cast %95 : vector<1x1x1x8x8xf32> to vector<8x8xf32>
    %97 = vector.shape_cast %94 : vector<8x8xf32> to vector<1x1x1x8x8xf32>
    tpu.vector_store %arg20[%c0_84, %c0_85, %c1_86, %c0_87, %c0_88], %97 {strides = array<i32>} : memref<2x2x2x8x8xf32, #tpu.memory_space<vmem>>, vector<1x1x1x8x8xf32>,
    %cst_89 = arith.constant dense<0.000000e+00> : vector<8x16xf32>
    %98 = tpu.matmul %94, %82, %cst_89 {dimension_numbers = #tpu.dot_dimension_numbers<[1], [0], [0], [1], [0, 0, 1, 1], [], []>} : vector<8x8xf32>, vector<8x16xf32>, vector<8x16xf32> -> vector<8x16xf32>
    %cst_90 = arith.constant dense<0.000000e+00> : vector<8x32xf32>
    %99 = tpu.matmul %98, %32, %cst_90 {dimension_numbers = #tpu.dot_dimension_numbers<[1], [0], [0], [1], [0, 0, 1, 1], [], []>} : vector<8x16xf32>, vector<16x32xf32>, vector<8x32xf32> -> vector<8x32xf32>
    %100 = arith.addf %79, %99 : vector<8x32xf32>
    %101 = vector.extract_strided_slice %44 {offsets = [8, 0], sizes = [8, 16], strides = [1, 1]} : vector<16x16xf32> to vector<8x16xf32>
    %102 = vector.extract_strided_slice %50 {offsets = [8, 0], sizes = [8, 16], strides = [1, 1]} : vector<16x16xf32> to vector<8x16xf32>
    %103 = vector.extract_strided_slice %56 {offsets = [8, 0], sizes = [8, 16], strides = [1, 1]} : vector<16x16xf32> to vector<8x16xf32>
    %cst_91 = arith.constant dense<0.000000e+00> : vector<8x8xf32>
    %104 = tpu.matmul %101, %102, %cst_91 {dimension_numbers = #tpu.dot_dimension_numbers<[1], [1], [0], [0], [0, 0, 1, 0], [], []>} : vector<8x16xf32>, vector<8x16xf32>, vector<8x8xf32> -> vector<8x8xf32>
    %105 = arith.addf %104, %4 : vector<8x8xf32>
    %cst_92 = arith.constant dense<0xFF800000> : vector<8xf32>
    %106 = vector.multi_reduction <maximumf>, %105, %cst_92 [1] : vector<8x8xf32> to vector<8xf32>
    %107 = vector.shape_cast %106 : vector<8xf32> to vector<8x1xf32>
    %108 = vector.broadcast %107 : vector<8x1xf32> to vector<8x8xf32>
    %109 = arith.subf %105, %108 : vector<8x8xf32>
    %110 = math.exp %109 : vector<8x8xf32>
    %cst_93 = arith.constant dense<0.000000e+00> : vector<8xf32>
    %111 = vector.multi_reduction <add>, %110, %cst_93 [1] : vector<8x8xf32> to vector<8xf32>
    %112 = vector.shape_cast %111 : vector<8xf32> to vector<8x1xf32>
    %113 = tpu.reciprocal %112 {approx = true} : vector<8x1xf32> -> vector<8x1xf32>
    %114 = vector.broadcast %113 : vector<8x1xf32> to vector<8x8xf32>
    %115 = arith.mulf %110, %114 : vector<8x8xf32>
    %c0_94 = arith.constant 0 : index
    %c1_95 = arith.constant 1 : index
    %c0_96 = arith.constant 0 : index
    %c0_97 = arith.constant 0 : index
    %c0_98 = arith.constant 0 : index
    %116 = vector.load %arg20[%c0_94, %c1_95, %c0_96, %c0_97, %c0_98] : memref<2x2x2x8x8xf32, #tpu.memory_space<vmem>>, vector<1x1x1x8x8xf32>
    %117 = vector.shape_cast %116 : vector<1x1x1x8x8xf32> to vector<8x8xf32>
    %118 = vector.shape_cast %115 : vector<8x8xf32> to vector<1x1x1x8x8xf32>
    tpu.vector_store %arg20[%c0_94, %c1_95, %c0_96, %c0_97, %c0_98], %118 {strides = array<i32>} : memref<2x2x2x8x8xf32, #tpu.memory_space<vmem>>, vector<1x1x1x8x8xf32>,
    %cst_99 = arith.constant dense<0.000000e+00> : vector<8x16xf32>
    %119 = tpu.matmul %115, %103, %cst_99 {dimension_numbers = #tpu.dot_dimension_numbers<[1], [0], [0], [1], [0, 0, 1, 1], [], []>} : vector<8x8xf32>, vector<8x16xf32>, vector<8x16xf32> -> vector<8x16xf32>
    %cst_100 = arith.constant dense<0.000000e+00> : vector<8x32xf32>
    %120 = tpu.matmul %119, %30, %cst_100 {dimension_numbers = #tpu.dot_dimension_numbers<[1], [0], [0], [1], [0, 0, 1, 1], [], []>} : vector<8x16xf32>, vector<16x32xf32>, vector<8x32xf32> -> vector<8x32xf32>
    %121 = vector.extract_strided_slice %47 {offsets = [8, 0], sizes = [8, 16], strides = [1, 1]} : vector<16x16xf32> to vector<8x16xf32>
    %122 = vector.extract_strided_slice %53 {offsets = [8, 0], sizes = [8, 16], strides = [1, 1]} : vector<16x16xf32> to vector<8x16xf32>
    %123 = vector.extract_strided_slice %59 {offsets = [8, 0], sizes = [8, 16], strides = [1, 1]} : vector<16x16xf32> to vector<8x16xf32>
    %cst_101 = arith.constant dense<0.000000e+00> : vector<8x8xf32>
    %124 = tpu.matmul %121, %122, %cst_101 {dimension_numbers = #tpu.dot_dimension_numbers<[1], [1], [0], [0], [0, 0, 1, 0], [], []>} : vector<8x16xf32>, vector<8x16xf32>, vector<8x8xf32> -> vector<8x8xf32>
    %125 = arith.addf %124, %4 : vector<8x8xf32>
    %cst_102 = arith.constant dense<0xFF800000> : vector<8xf32>
    %126 = vector.multi_reduction <maximumf>, %125, %cst_102 [1] : vector<8x8xf32> to vector<8xf32>
    %127 = vector.shape_cast %126 : vector<8xf32> to vector<8x1xf32>
    %128 = vector.broadcast %127 : vector<8x1xf32> to vector<8x8xf32>
    %129 = arith.subf %125, %128 : vector<8x8xf32>
    %130 = math.exp %129 : vector<8x8xf32>
    %cst_103 = arith.constant dense<0.000000e+00> : vector<8xf32>
    %131 = vector.multi_reduction <add>, %130, %cst_103 [1] : vector<8x8xf32> to vector<8xf32>
    %132 = vector.shape_cast %131 : vector<8xf32> to vector<8x1xf32>
    %133 = tpu.reciprocal %132 {approx = true} : vector<8x1xf32> -> vector<8x1xf32>
    %134 = vector.broadcast %133 : vector<8x1xf32> to vector<8x8xf32>
    %135 = arith.mulf %130, %134 : vector<8x8xf32>
    %c0_104 = arith.constant 0 : index
    %c1_105 = arith.constant 1 : index
    %c1_106 = arith.constant 1 : index
    %c0_107 = arith.constant 0 : index
    %c0_108 = arith.constant 0 : index
    %136 = vector.load %arg20[%c0_104, %c1_105, %c1_106, %c0_107, %c0_108] : memref<2x2x2x8x8xf32, #tpu.memory_space<vmem>>, vector<1x1x1x8x8xf32>
    %137 = vector.shape_cast %136 : vector<1x1x1x8x8xf32> to vector<8x8xf32>
    %138 = vector.shape_cast %135 : vector<8x8xf32> to vector<1x1x1x8x8xf32>
    tpu.vector_store %arg20[%c0_104, %c1_105, %c1_106, %c0_107, %c0_108], %138 {strides = array<i32>} : memref<2x2x2x8x8xf32, #tpu.memory_space<vmem>>, vector<1x1x1x8x8xf32>,
    %cst_109 = arith.constant dense<0.000000e+00> : vector<8x16xf32>
    %139 = tpu.matmul %135, %123, %cst_109 {dimension_numbers = #tpu.dot_dimension_numbers<[1], [0], [0], [1], [0, 0, 1, 1], [], []>} : vector<8x8xf32>, vector<8x16xf32>, vector<8x16xf32> -> vector<8x16xf32>
    %cst_110 = arith.constant dense<0.000000e+00> : vector<8x32xf32>
    %140 = tpu.matmul %139, %32, %cst_110 {dimension_numbers = #tpu.dot_dimension_numbers<[1], [0], [0], [1], [0, 0, 1, 1], [], []>} : vector<8x16xf32>, vector<16x32xf32>, vector<8x32xf32> -> vector<8x32xf32>
    %141 = arith.addf %120, %140 : vector<8x32xf32>
    %142 = tpu.concatenate %100, %141 in 0 : vector<8x32xf32>, vector<8x32xf32> -> vector<16x32xf32>
    %143 = vector.broadcast %33 : vector<1x32xf32> to vector<16x32xf32>
    %144 = arith.addf %142, %143 : vector<16x32xf32>
    %145 = arith.addf %144, %0 : vector<16x32xf32>
    %cst_111 = arith.constant dense<0.000000e+00> : vector<16xf32>
    %146 = vector.multi_reduction <add>, %145, %cst_111 [1] : vector<16x32xf32> to vector<16xf32>
    %147 = vector.shape_cast %146 : vector<16xf32> to vector<16x1xf32>
    %cst_112 = arith.constant 3.200000e+01 : f32
    %148 = vector.broadcast %cst_112 : f32 to vector<16x1xf32>
    %149 = arith.divf %147, %148 : vector<16x1xf32>
    %150 = vector.broadcast %149 : vector<16x1xf32> to vector<16x32xf32>
    %151 = arith.subf %145, %150 : vector<16x32xf32>
    %152 = arith.mulf %151, %151 : vector<16x32xf32>
    %cst_113 = arith.constant dense<0.000000e+00> : vector<16xf32>
    %153 = vector.multi_reduction <add>, %152, %cst_113 [1] : vector<16x32xf32> to vector<16xf32>
    %154 = vector.shape_cast %153 : vector<16xf32> to vector<16x1xf32>
    %cst_114 = arith.constant 3.200000e+01 : f32
    %155 = vector.broadcast %cst_114 : f32 to vector<16x1xf32>
    %156 = arith.divf %154, %155 : vector<16x1xf32>
    %157 = vector.broadcast %149 : vector<16x1xf32> to vector<16x32xf32>
    %158 = arith.subf %145, %157 : vector<16x32xf32>
    %cst_115 = arith.constant 9.99999996E-13 : f32
    %159 = vector.broadcast %cst_115 : f32 to vector<16x1xf32>
    %160 = arith.addf %156, %159 : vector<16x1xf32>
    %161 = math.rsqrt %160 : vector<16x1xf32>
    %162 = vector.broadcast %161 : vector<16x1xf32> to vector<16x32xf32>
    %163 = arith.mulf %158, %162 : vector<16x32xf32>
    %164 = vector.broadcast %34 : vector<1x32xf32> to vector<16x32xf32>
    %165 = arith.mulf %163, %164 : vector<16x32xf32>
    %166 = vector.broadcast %35 : vector<1x32xf32> to vector<16x32xf32>
    %167 = arith.addf %165, %166 : vector<16x32xf32>
    %cst_116 = arith.constant dense<0.000000e+00> : vector<16x64xf32>
    %168 = tpu.matmul %167, %38, %cst_116 {dimension_numbers = #tpu.dot_dimension_numbers<[1], [0], [0], [1], [0, 0, 1, 1], [], []>} : vector<16x32xf32>, vector<32x64xf32>, vector<16x64xf32> -> vector<16x64xf32>
    %169 = vector.broadcast %39 : vector<1x64xf32> to vector<16x64xf32>
    %170 = arith.addf %168, %169 : vector<16x64xf32>
    %cst_117 = arith.constant 5.000000e-01 : f32
    %171 = vector.broadcast %cst_117 : f32 to vector<16x64xf32>
    %172 = arith.mulf %171, %170 : vector<16x64xf32>
    %cst_118 = arith.constant 0.707106769 : f32
    %173 = vector.broadcast %cst_118 : f32 to vector<16x64xf32>
    %174 = arith.mulf %170, %173 : vector<16x64xf32>
    %175 = math.erf %174 : vector<16x64xf32>
    %cst_119 = arith.constant 1.000000e+00 : f32
    %176 = vector.broadcast %cst_119 : f32 to vector<16x64xf32>
    %177 = arith.addf %176, %175 : vector<16x64xf32>
    %178 = arith.mulf %172, %177 : vector<16x64xf32>
    %cst_120 = arith.constant dense<0.000000e+00> : vector<16x32xf32>
    %179 = tpu.matmul %178, %40, %cst_120 {dimension_numbers = #tpu.dot_dimension_numbers<[1], [0], [0], [1], [0, 0, 1, 1], [], []>} : vector<16x64xf32>, vector<64x32xf32>, vector<16x32xf32> -> vector<16x32xf32>
    %180 = vector.broadcast %41 : vector<1x32xf32> to vector<16x32xf32>
    %181 = arith.addf %179, %180 : vector<16x32xf32>
    %182 = arith.addf %181, %167 : vector<16x32xf32>
    %cst_121 = arith.constant dense<0.000000e+00> : vector<16xf32>
    %183 = vector.multi_reduction <add>, %182, %cst_121 [1] : vector<16x32xf32> to vector<16xf32>
    %184 = vector.shape_cast %183 : vector<16xf32> to vector<16x1xf32>
    %cst_122 = arith.constant 3.200000e+01 : f32
    %185 = vector.broadcast %cst_122 : f32 to vector<16x1xf32>
    %186 = arith.divf %184, %185 : vector<16x1xf32>
    %187 = vector.broadcast %186 : vector<16x1xf32> to vector<16x32xf32>
    %188 = arith.subf %182, %187 : vector<16x32xf32>
    %189 = arith.mulf %188, %188 : vector<16x32xf32>
    %cst_123 = arith.constant dense<0.000000e+00> : vector<16xf32>
    %190 = vector.multi_reduction <add>, %189, %cst_123 [1] : vector<16x32xf32> to vector<16xf32>
    %191 = vector.shape_cast %190 : vector<16xf32> to vector<16x1xf32>
    %cst_124 = arith.constant 3.200000e+01 : f32
    %192 = vector.broadcast %cst_124 : f32 to vector<16x1xf32>
    %193 = arith.divf %191, %192 : vector<16x1xf32>
    %194 = vector.broadcast %186 : vector<16x1xf32> to vector<16x32xf32>
    %195 = arith.subf %182, %194 : vector<16x32xf32>
    %cst_125 = arith.constant 9.99999996E-13 : f32
    %196 = vector.broadcast %cst_125 : f32 to vector<16x1xf32>
    %197 = arith.addf %193, %196 : vector<16x1xf32>
    %198 = math.rsqrt %197 : vector<16x1xf32>
    %199 = vector.broadcast %198 : vector<16x1xf32> to vector<16x32xf32>
    %200 = arith.mulf %195, %199 : vector<16x32xf32>
    %201 = vector.broadcast %36 : vector<1x32xf32> to vector<16x32xf32>
    %202 = arith.mulf %200, %201 : vector<16x32xf32>
    %203 = vector.broadcast %37 : vector<1x32xf32> to vector<16x32xf32>
    %204 = arith.addf %202, %203 : vector<16x32xf32>
    %cst_126 = arith.constant dense<0.000000e+00> : vector<16x16xf32>
    %205 = tpu.matmul %204, %6, %cst_126 {dimension_numbers = #tpu.dot_dimension_numbers<[1], [0], [0], [1], [0, 0, 1, 1], [], []>} : vector<16x32xf32>, vector<32x16xf32>, vector<16x16xf32> -> vector<16x16xf32>
    %206 = vector.broadcast %10 : vector<1x16xf32> to vector<16x16xf32>
    %207 = arith.addf %205, %206 : vector<16x16xf32>
    %cst_127 = arith.constant dense<0.000000e+00> : vector<16x16xf32>
    %208 = tpu.matmul %204, %8, %cst_127 {dimension_numbers = #tpu.dot_dimension_numbers<[1], [0], [0], [1], [0, 0, 1, 1], [], []>} : vector<16x32xf32>, vector<32x16xf32>, vector<16x16xf32> -> vector<16x16xf32>
    %209 = vector.broadcast %12 : vector<1x16xf32> to vector<16x16xf32>
    %210 = arith.addf %208, %209 : vector<16x16xf32>
    %cst_128 = arith.constant dense<0.000000e+00> : vector<16x16xf32>
    %211 = tpu.matmul %204, %14, %cst_128 {dimension_numbers = #tpu.dot_dimension_numbers<[1], [0], [0], [1], [0, 0, 1, 1], [], []>} : vector<16x32xf32>, vector<32x16xf32>, vector<16x16xf32> -> vector<16x16xf32>
    %212 = vector.broadcast %18 : vector<1x16xf32> to vector<16x16xf32>
    %213 = arith.addf %211, %212 : vector<16x16xf32>
    %cst_129 = arith.constant dense<0.000000e+00> : vector<16x16xf32>
    %214 = tpu.matmul %204, %16, %cst_129 {dimension_numbers = #tpu.dot_dimension_numbers<[1], [0], [0], [1], [0, 0, 1, 1], [], []>} : vector<16x32xf32>, vector<32x16xf32>, vector<16x16xf32> -> vector<16x16xf32>
    %215 = vector.broadcast %20 : vector<1x16xf32> to vector<16x16xf32>
    %216 = arith.addf %214, %215 : vector<16x16xf32>
    %cst_130 = arith.constant dense<0.000000e+00> : vector<16x16xf32>
    %217 = tpu.matmul %204, %22, %cst_130 {dimension_numbers = #tpu.dot_dimension_numbers<[1], [0], [0], [1], [0, 0, 1, 1], [], []>} : vector<16x32xf32>, vector<32x16xf32>, vector<16x16xf32> -> vector<16x16xf32>
    %218 = vector.broadcast %26 : vector<1x16xf32> to vector<16x16xf32>
    %219 = arith.addf %217, %218 : vector<16x16xf32>
    %cst_131 = arith.constant dense<0.000000e+00> : vector<16x16xf32>
    %220 = tpu.matmul %204, %24, %cst_131 {dimension_numbers = #tpu.dot_dimension_numbers<[1], [0], [0], [1], [0, 0, 1, 1], [], []>} : vector<16x32xf32>, vector<32x16xf32>, vector<16x16xf32> -> vector<16x16xf32>
    %221 = vector.broadcast %28 : vector<1x16xf32> to vector<16x16xf32>
    %222 = arith.addf %220, %221 : vector<16x16xf32>
    %223 = vector.extract_strided_slice %207 {offsets = [0, 0], sizes = [8, 16], strides = [1, 1]} : vector<16x16xf32> to vector<8x16xf32>
    %224 = vector.extract_strided_slice %213 {offsets = [0, 0], sizes = [8, 16], strides = [1, 1]} : vector<16x16xf32> to vector<8x16xf32>
    %225 = vector.extract_strided_slice %219 {offsets = [0, 0], sizes = [8, 16], strides = [1, 1]} : vector<16x16xf32> to vector<8x16xf32>
    %cst_132 = arith.constant dense<0.000000e+00> : vector<8x8xf32>
    %226 = tpu.matmul %223, %224, %cst_132 {dimension_numbers = #tpu.dot_dimension_numbers<[1], [1], [0], [0], [0, 0, 1, 0], [], []>} : vector<8x16xf32>, vector<8x16xf32>, vector<8x8xf32> -> vector<8x8xf32>
    %227 = arith.addf %226, %2 : vector<8x8xf32>
    %cst_133 = arith.constant dense<0xFF800000> : vector<8xf32>
    %228 = vector.multi_reduction <maximumf>, %227, %cst_133 [1] : vector<8x8xf32> to vector<8xf32>
    %229 = vector.shape_cast %228 : vector<8xf32> to vector<8x1xf32>
    %230 = vector.broadcast %229 : vector<8x1xf32> to vector<8x8xf32>
    %231 = arith.subf %227, %230 : vector<8x8xf32>
    %232 = math.exp %231 : vector<8x8xf32>
    %cst_134 = arith.constant dense<0.000000e+00> : vector<8xf32>
    %233 = vector.multi_reduction <add>, %232, %cst_134 [1] : vector<8x8xf32> to vector<8xf32>
    %234 = vector.shape_cast %233 : vector<8xf32> to vector<8x1xf32>
    %235 = tpu.reciprocal %234 {approx = true} : vector<8x1xf32> -> vector<8x1xf32>
    %236 = vector.broadcast %235 : vector<8x1xf32> to vector<8x8xf32>
    %237 = arith.mulf %232, %236 : vector<8x8xf32>
    %c1_135 = arith.constant 1 : index
    %c0_136 = arith.constant 0 : index
    %c0_137 = arith.constant 0 : index
    %c0_138 = arith.constant 0 : index
    %c0_139 = arith.constant 0 : index
    %238 = vector.load %arg20[%c1_135, %c0_136, %c0_137, %c0_138, %c0_139] : memref<2x2x2x8x8xf32, #tpu.memory_space<vmem>>, vector<1x1x1x8x8xf32>
    %239 = vector.shape_cast %238 : vector<1x1x1x8x8xf32> to vector<8x8xf32>
    %240 = vector.shape_cast %237 : vector<8x8xf32> to vector<1x1x1x8x8xf32>
    tpu.vector_store %arg20[%c1_135, %c0_136, %c0_137, %c0_138, %c0_139], %240 {strides = array<i32>} : memref<2x2x2x8x8xf32, #tpu.memory_space<vmem>>, vector<1x1x1x8x8xf32>,
    %cst_140 = arith.constant dense<0.000000e+00> : vector<8x16xf32>
    %241 = tpu.matmul %237, %225, %cst_140 {dimension_numbers = #tpu.dot_dimension_numbers<[1], [0], [0], [1], [0, 0, 1, 1], [], []>} : vector<8x8xf32>, vector<8x16xf32>, vector<8x16xf32> -> vector<8x16xf32>
    %cst_141 = arith.constant dense<0.000000e+00> : vector<8x32xf32>
    %242 = tpu.matmul %241, %30, %cst_141 {dimension_numbers = #tpu.dot_dimension_numbers<[1], [0], [0], [1], [0, 0, 1, 1], [], []>} : vector<8x16xf32>, vector<16x32xf32>, vector<8x32xf32> -> vector<8x32xf32>
    %243 = vector.extract_strided_slice %210 {offsets = [0, 0], sizes = [8, 16], strides = [1, 1]} : vector<16x16xf32> to vector<8x16xf32>
    %244 = vector.extract_strided_slice %216 {offsets = [0, 0], sizes = [8, 16], strides = [1, 1]} : vector<16x16xf32> to vector<8x16xf32>
    %245 = vector.extract_strided_slice %222 {offsets = [0, 0], sizes = [8, 16], strides = [1, 1]} : vector<16x16xf32> to vector<8x16xf32>
    %cst_142 = arith.constant dense<0.000000e+00> : vector<8x8xf32>
    %246 = tpu.matmul %243, %244, %cst_142 {dimension_numbers = #tpu.dot_dimension_numbers<[1], [1], [0], [0], [0, 0, 1, 0], [], []>} : vector<8x16xf32>, vector<8x16xf32>, vector<8x8xf32> -> vector<8x8xf32>
    %247 = arith.addf %246, %2 : vector<8x8xf32>
    %cst_143 = arith.constant dense<0xFF800000> : vector<8xf32>
    %248 = vector.multi_reduction <maximumf>, %247, %cst_143 [1] : vector<8x8xf32> to vector<8xf32>
    %249 = vector.shape_cast %248 : vector<8xf32> to vector<8x1xf32>
    %250 = vector.broadcast %249 : vector<8x1xf32> to vector<8x8xf32>
    %251 = arith.subf %247, %250 : vector<8x8xf32>
    %252 = math.exp %251 : vector<8x8xf32>
    %cst_144 = arith.constant dense<0.000000e+00> : vector<8xf32>
    %253 = vector.multi_reduction <add>, %252, %cst_144 [1] : vector<8x8xf32> to vector<8xf32>
    %254 = vector.shape_cast %253 : vector<8xf32> to vector<8x1xf32>
    %255 = tpu.reciprocal %254 {approx = true} : vector<8x1xf32> -> vector<8x1xf32>
    %256 = vector.broadcast %255 : vector<8x1xf32> to vector<8x8xf32>
    %257 = arith.mulf %252, %256 : vector<8x8xf32>
    %c1_145 = arith.constant 1 : index
    %c0_146 = arith.constant 0 : index
    %c1_147 = arith.constant 1 : index
    %c0_148 = arith.constant 0 : index
    %c0_149 = arith.constant 0 : index
    %258 = vector.load %arg20[%c1_145, %c0_146, %c1_147, %c0_148, %c0_149] : memref<2x2x2x8x8xf32, #tpu.memory_space<vmem>>, vector<1x1x1x8x8xf32>
    %259 = vector.shape_cast %258 : vector<1x1x1x8x8xf32> to vector<8x8xf32>
    %260 = vector.shape_cast %257 : vector<8x8xf32> to vector<1x1x1x8x8xf32>
    tpu.vector_store %arg20[%c1_145, %c0_146, %c1_147, %c0_148, %c0_149], %260 {strides = array<i32>} : memref<2x2x2x8x8xf32, #tpu.memory_space<vmem>>, vector<1x1x1x8x8xf32>,
    %cst_150 = arith.constant dense<0.000000e+00> : vector<8x16xf32>
    %261 = tpu.matmul %257, %245, %cst_150 {dimension_numbers = #tpu.dot_dimension_numbers<[1], [0], [0], [1], [0, 0, 1, 1], [], []>} : vector<8x8xf32>, vector<8x16xf32>, vector<8x16xf32> -> vector<8x16xf32>
    %cst_151 = arith.constant dense<0.000000e+00> : vector<8x32xf32>
    %262 = tpu.matmul %261, %32, %cst_151 {dimension_numbers = #tpu.dot_dimension_numbers<[1], [0], [0], [1], [0, 0, 1, 1], [], []>} : vector<8x16xf32>, vector<16x32xf32>, vector<8x32xf32> -> vector<8x32xf32>
    %263 = arith.addf %242, %262 : vector<8x32xf32>
    %264 = vector.extract_strided_slice %207 {offsets = [8, 0], sizes = [8, 16], strides = [1, 1]} : vector<16x16xf32> to vector<8x16xf32>
    %265 = vector.extract_strided_slice %213 {offsets = [8, 0], sizes = [8, 16], strides = [1, 1]} : vector<16x16xf32> to vector<8x16xf32>
    %266 = vector.extract_strided_slice %219 {offsets = [8, 0], sizes = [8, 16], strides = [1, 1]} : vector<16x16xf32> to vector<8x16xf32>
    %cst_152 = arith.constant dense<0.000000e+00> : vector<8x8xf32>
    %267 = tpu.matmul %264, %265, %cst_152 {dimension_numbers = #tpu.dot_dimension_numbers<[1], [1], [0], [0], [0, 0, 1, 0], [], []>} : vector<8x16xf32>, vector<8x16xf32>, vector<8x8xf32> -> vector<8x8xf32>
    %268 = arith.addf %267, %4 : vector<8x8xf32>
    %cst_153 = arith.constant dense<0xFF800000> : vector<8xf32>
    %269 = vector.multi_reduction <maximumf>, %268, %cst_153 [1] : vector<8x8xf32> to vector<8xf32>
    %270 = vector.shape_cast %269 : vector<8xf32> to vector<8x1xf32>
    %271 = vector.broadcast %270 : vector<8x1xf32> to vector<8x8xf32>
    %272 = arith.subf %268, %271 : vector<8x8xf32>
    %273 = math.exp %272 : vector<8x8xf32>
    %cst_154 = arith.constant dense<0.000000e+00> : vector<8xf32>
    %274 = vector.multi_reduction <add>, %273, %cst_154 [1] : vector<8x8xf32> to vector<8xf32>
    %275 = vector.shape_cast %274 : vector<8xf32> to vector<8x1xf32>
    %276 = tpu.reciprocal %275 {approx = true} : vector<8x1xf32> -> vector<8x1xf32>
    %277 = vector.broadcast %276 : vector<8x1xf32> to vector<8x8xf32>
    %278 = arith.mulf %273, %277 : vector<8x8xf32>
    %c1_155 = arith.constant 1 : index
    %c1_156 = arith.constant 1 : index
    %c0_157 = arith.constant 0 : index
    %c0_158 = arith.constant 0 : index
    %c0_159 = arith.constant 0 : index
    %279 = vector.load %arg20[%c1_155, %c1_156, %c0_157, %c0_158, %c0_159] : memref<2x2x2x8x8xf32, #tpu.memory_space<vmem>>, vector<1x1x1x8x8xf32>
    %280 = vector.shape_cast %279 : vector<1x1x1x8x8xf32> to vector<8x8xf32>
    %281 = vector.shape_cast %278 : vector<8x8xf32> to vector<1x1x1x8x8xf32>
    tpu.vector_store %arg20[%c1_155, %c1_156, %c0_157, %c0_158, %c0_159], %281 {strides = array<i32>} : memref<2x2x2x8x8xf32, #tpu.memory_space<vmem>>, vector<1x1x1x8x8xf32>,
    %cst_160 = arith.constant dense<0.000000e+00> : vector<8x16xf32>
    %282 = tpu.matmul %278, %266, %cst_160 {dimension_numbers = #tpu.dot_dimension_numbers<[1], [0], [0], [1], [0, 0, 1, 1], [], []>} : vector<8x8xf32>, vector<8x16xf32>, vector<8x16xf32> -> vector<8x16xf32>
    %cst_161 = arith.constant dense<0.000000e+00> : vector<8x32xf32>
    %283 = tpu.matmul %282, %30, %cst_161 {dimension_numbers = #tpu.dot_dimension_numbers<[1], [0], [0], [1], [0, 0, 1, 1], [], []>} : vector<8x16xf32>, vector<16x32xf32>, vector<8x32xf32> -> vector<8x32xf32>
    %284 = vector.extract_strided_slice %210 {offsets = [8, 0], sizes = [8, 16], strides = [1, 1]} : vector<16x16xf32> to vector<8x16xf32>
    %285 = vector.extract_strided_slice %216 {offsets = [8, 0], sizes = [8, 16], strides = [1, 1]} : vector<16x16xf32> to vector<8x16xf32>
    %286 = vector.extract_strided_slice %222 {offsets = [8, 0], sizes = [8, 16], strides = [1, 1]} : vector<16x16xf32> to vector<8x16xf32>
    %cst_162 = arith.constant dense<0.000000e+00> : vector<8x8xf32>
    %287 = tpu.matmul %284, %285, %cst_162 {dimension_numbers = #tpu.dot_dimension_numbers<[1], [1], [0], [0], [0, 0, 1, 0], [], []>} : vector<8x16xf32>, vector<8x16xf32>, vector<8x8xf32> -> vector<8x8xf32>
    %288 = arith.addf %287, %4 : vector<8x8xf32>
    %cst_163 = arith.constant dense<0xFF800000> : vector<8xf32>
    %289 = vector.multi_reduction <maximumf>, %288, %cst_163 [1] : vector<8x8xf32> to vector<8xf32>
    %290 = vector.shape_cast %289 : vector<8xf32> to vector<8x1xf32>
    %291 = vector.broadcast %290 : vector<8x1xf32> to vector<8x8xf32>
    %292 = arith.subf %288, %291 : vector<8x8xf32>
    %293 = math.exp %292 : vector<8x8xf32>
    %cst_164 = arith.constant dense<0.000000e+00> : vector<8xf32>
    %294 = vector.multi_reduction <add>, %293, %cst_164 [1] : vector<8x8xf32> to vector<8xf32>
    %295 = vector.shape_cast %294 : vector<8xf32> to vector<8x1xf32>
    %296 = tpu.reciprocal %295 {approx = true} : vector<8x1xf32> -> vector<8x1xf32>
    %297 = vector.broadcast %296 : vector<8x1xf32> to vector<8x8xf32>
    %298 = arith.mulf %293, %297 : vector<8x8xf32>
    %c1_165 = arith.constant 1 : index
    %c1_166 = arith.constant 1 : index
    %c1_167 = arith.constant 1 : index
    %c0_168 = arith.constant 0 : index
    %c0_169 = arith.constant 0 : index
    %299 = vector.load %arg20[%c1_165, %c1_166, %c1_167, %c0_168, %c0_169] : memref<2x2x2x8x8xf32, #tpu.memory_space<vmem>>, vector<1x1x1x8x8xf32>
    %300 = vector.shape_cast %299 : vector<1x1x1x8x8xf32> to vector<8x8xf32>
    %301 = vector.shape_cast %298 : vector<8x8xf32> to vector<1x1x1x8x8xf32>
    tpu.vector_store %arg20[%c1_165, %c1_166, %c1_167, %c0_168, %c0_169], %301 {strides = array<i32>} : memref<2x2x2x8x8xf32, #tpu.memory_space<vmem>>, vector<1x1x1x8x8xf32>,
    %cst_170 = arith.constant dense<0.000000e+00> : vector<8x16xf32>
    %302 = tpu.matmul %298, %286, %cst_170 {dimension_numbers = #tpu.dot_dimension_numbers<[1], [0], [0], [1], [0, 0, 1, 1], [], []>} : vector<8x8xf32>, vector<8x16xf32>, vector<8x16xf32> -> vector<8x16xf32>
    %cst_171 = arith.constant dense<0.000000e+00> : vector<8x32xf32>
    %303 = tpu.matmul %302, %32, %cst_171 {dimension_numbers = #tpu.dot_dimension_numbers<[1], [0], [0], [1], [0, 0, 1, 1], [], []>} : vector<8x16xf32>, vector<16x32xf32>, vector<8x32xf32> -> vector<8x32xf32>
    %304 = arith.addf %283, %303 : vector<8x32xf32>
    %305 = tpu.concatenate %263, %304 in 0 : vector<8x32xf32>, vector<8x32xf32> -> vector<16x32xf32>
    %306 = vector.broadcast %33 : vector<1x32xf32> to vector<16x32xf32>
    %307 = arith.addf %305, %306 : vector<16x32xf32>
    %308 = arith.addf %307, %204 : vector<16x32xf32>
    %cst_172 = arith.constant dense<0.000000e+00> : vector<16xf32>
    %309 = vector.multi_reduction <add>, %308, %cst_172 [1] : vector<16x32xf32> to vector<16xf32>
    %310 = vector.shape_cast %309 : vector<16xf32> to vector<16x1xf32>
    %cst_173 = arith.constant 3.200000e+01 : f32
    %311 = vector.broadcast %cst_173 : f32 to vector<16x1xf32>
    %312 = arith.divf %310, %311 : vector<16x1xf32>
    %313 = vector.broadcast %312 : vector<16x1xf32> to vector<16x32xf32>
    %314 = arith.subf %308, %313 : vector<16x32xf32>
    %315 = arith.mulf %314, %314 : vector<16x32xf32>
    %cst_174 = arith.constant dense<0.000000e+00> : vector<16xf32>
    %316 = vector.multi_reduction <add>, %315, %cst_174 [1] : vector<16x32xf32> to vector<16xf32>
    %317 = vector.shape_cast %316 : vector<16xf32> to vector<16x1xf32>
    %cst_175 = arith.constant 3.200000e+01 : f32
    %318 = vector.broadcast %cst_175 : f32 to vector<16x1xf32>
    %319 = arith.divf %317, %318 : vector<16x1xf32>
    %320 = vector.broadcast %312 : vector<16x1xf32> to vector<16x32xf32>
    %321 = arith.subf %308, %320 : vector<16x32xf32>
    %cst_176 = arith.constant 9.99999996E-13 : f32
    %322 = vector.broadcast %cst_176 : f32 to vector<16x1xf32>
    %323 = arith.addf %319, %322 : vector<16x1xf32>
    %324 = math.rsqrt %323 : vector<16x1xf32>
    %325 = vector.broadcast %324 : vector<16x1xf32> to vector<16x32xf32>
    %326 = arith.mulf %321, %325 : vector<16x32xf32>
    %327 = vector.broadcast %34 : vector<1x32xf32> to vector<16x32xf32>
    %328 = arith.mulf %326, %327 : vector<16x32xf32>
    %329 = vector.broadcast %35 : vector<1x32xf32> to vector<16x32xf32>
    %330 = arith.addf %328, %329 : vector<16x32xf32>
    %cst_177 = arith.constant dense<0.000000e+00> : vector<16x64xf32>
    %331 = tpu.matmul %330, %38, %cst_177 {dimension_numbers = #tpu.dot_dimension_numbers<[1], [0], [0], [1], [0, 0, 1, 1], [], []>} : vector<16x32xf32>, vector<32x64xf32>, vector<16x64xf32> -> vector<16x64xf32>
    %332 = vector.broadcast %39 : vector<1x64xf32> to vector<16x64xf32>
    %333 = arith.addf %331, %332 : vector<16x64xf32>
    %cst_178 = arith.constant 5.000000e-01 : f32
    %334 = vector.broadcast %cst_178 : f32 to vector<16x64xf32>
    %335 = arith.mulf %334, %333 : vector<16x64xf32>
    %cst_179 = arith.constant 0.707106769 : f32
    %336 = vector.broadcast %cst_179 : f32 to vector<16x64xf32>
    %337 = arith.mulf %333, %336 : vector<16x64xf32>
    %338 = math.erf %337 : vector<16x64xf32>
    %cst_180 = arith.constant 1.000000e+00 : f32
    %339 = vector.broadcast %cst_180 : f32 to vector<16x64xf32>
    %340 = arith.addf %339, %338 : vector<16x64xf32>
    %341 = arith.mulf %335, %340 : vector<16x64xf32>
    %cst_181 = arith.constant dense<0.000000e+00> : vector<16x32xf32>
    %342 = tpu.matmul %341, %40, %cst_181 {dimension_numbers = #tpu.dot_dimension_numbers<[1], [0], [0], [1], [0, 0, 1, 1], [], []>} : vector<16x64xf32>, vector<64x32xf32>, vector<16x32xf32> -> vector<16x32xf32>
    %343 = vector.broadcast %41 : vector<1x32xf32> to vector<16x32xf32>
    %344 = arith.addf %342, %343 : vector<16x32xf32>
    %345 = arith.addf %344, %330 : vector<16x32xf32>
    %cst_182 = arith.constant dense<0.000000e+00> : vector<16xf32>
    %346 = vector.multi_reduction <add>, %345, %cst_182 [1] : vector<16x32xf32> to vector<16xf32>
    %347 = vector.shape_cast %346 : vector<16xf32> to vector<16x1xf32>
    %cst_183 = arith.constant 3.200000e+01 : f32
    %348 = vector.broadcast %cst_183 : f32 to vector<16x1xf32>
    %349 = arith.divf %347, %348 : vector<16x1xf32>
    %350 = vector.broadcast %349 : vector<16x1xf32> to vector<16x32xf32>
    %351 = arith.subf %345, %350 : vector<16x32xf32>
    %352 = arith.mulf %351, %351 : vector<16x32xf32>
    %cst_184 = arith.constant dense<0.000000e+00> : vector<16xf32>
    %353 = vector.multi_reduction <add>, %352, %cst_184 [1] : vector<16x32xf32> to vector<16xf32>
    %354 = vector.shape_cast %353 : vector<16xf32> to vector<16x1xf32>
    %cst_185 = arith.constant 3.200000e+01 : f32
    %355 = vector.broadcast %cst_185 : f32 to vector<16x1xf32>
    %356 = arith.divf %354, %355 : vector<16x1xf32>
    %357 = vector.broadcast %349 : vector<16x1xf32> to vector<16x32xf32>
    %358 = arith.subf %345, %357 : vector<16x32xf32>
    %cst_186 = arith.constant 9.99999996E-13 : f32
    %359 = vector.broadcast %cst_186 : f32 to vector<16x1xf32>
    %360 = arith.addf %356, %359 : vector<16x1xf32>
    %361 = math.rsqrt %360 : vector<16x1xf32>
    %362 = vector.broadcast %361 : vector<16x1xf32> to vector<16x32xf32>
    %363 = arith.mulf %358, %362 : vector<16x32xf32>
    %364 = vector.broadcast %36 : vector<1x32xf32> to vector<16x32xf32>
    %365 = arith.mulf %363, %364 : vector<16x32xf32>
    %366 = vector.broadcast %37 : vector<1x32xf32> to vector<16x32xf32>
    %367 = arith.addf %365, %366 : vector<16x32xf32>
    %c0_187 = arith.constant 0 : index
    %c0_188 = arith.constant 0 : index
    %368 = vector.load %arg19[%c0_187, %c0_188] : memref<16x32xf32, #tpu.memory_space<vmem>>, vector<16x32xf32>
    tpu.vector_store %arg19[%c0_187, %c0_188], %367 {strides = array<i32>} : memref<16x32xf32, #tpu.memory_space<vmem>>, vector<16x32xf32>,
    return
  }
  func.func @transform_0(%arg0: i32) -> (i32, i32) {
    %c0_i32 = arith.constant 0 : i32
    %c0_i32_0 = arith.constant 0 : i32
    %c0_i32_1 = arith.constant 0 : i32
    return %c0_i32, %c0_i32_0 : i32, i32
  }
  func.func @transform_1(%arg0: i32) -> (i32, i32, i32) {
    %c0_i32 = arith.constant 0 : i32
    %c0_i32_0 = arith.constant 0 : i32
    %c0_i32_1 = arith.constant 0 : i32
    %c0_i32_2 = arith.constant 0 : i32
    return %c0_i32, %c0_i32_0, %c0_i32_1 : i32, i32, i32
  }
  func.func @transform_2(%arg0: i32) -> (i32, i32, i32) {
    %c0_i32 = arith.constant 0 : i32
    %c0_i32_0 = arith.constant 0 : i32
    %c0_i32_1 = arith.constant 0 : i32
    %c0_i32_2 = arith.constant 0 : i32
    return %c0_i32, %c0_i32_0, %c0_i32_1 : i32, i32, i32
  }
  func.func @transform_3(%arg0: i32) -> (i32, i32, i32) {
    %c0_i32 = arith.constant 0 : i32
    %c0_i32_0 = arith.constant 0 : i32
    %c0_i32_1 = arith.constant 0 : i32
    %c0_i32_2 = arith.constant 0 : i32
    return %c0_i32, %c0_i32_0, %c0_i32_1 : i32, i32, i32
  }
  func.func @transform_4(%arg0: i32) -> (i32, i32, i32) {
    %c0_i32 = arith.constant 0 : i32
    %c0_i32_0 = arith.constant 0 : i32
    %c0_i32_1 = arith.constant 0 : i32
    %c0_i32_2 = arith.constant 0 : i32
    return %c0_i32, %c0_i32_0, %c0_i32_1 : i32, i32, i32
  }
  func.func @transform_5(%arg0: i32) -> (i32, i32, i32) {
    %c0_i32 = arith.constant 0 : i32
    %c0_i32_0 = arith.constant 0 : i32
    %c0_i32_1 = arith.constant 0 : i32
    %c0_i32_2 = arith.constant 0 : i32
    return %c0_i32, %c0_i32_0, %c0_i32_1 : i32, i32, i32
  }
  func.func @transform_6(%arg0: i32) -> (i32, i32, i32) {
    %c0_i32 = arith.constant 0 : i32
    %c0_i32_0 = arith.constant 0 : i32
    %c0_i32_1 = arith.constant 0 : i32
    %c0_i32_2 = arith.constant 0 : i32
    return %c0_i32, %c0_i32_0, %c0_i32_1 : i32, i32, i32
  }
  func.func @transform_7(%arg0: i32) -> (i32, i32, i32) {
    %c0_i32 = arith.constant 0 : i32
    %c0_i32_0 = arith.constant 0 : i32
    %c0_i32_1 = arith.constant 0 : i32
    %c0_i32_2 = arith.constant 0 : i32
    return %c0_i32, %c0_i32_0, %c0_i32_1 : i32, i32, i32
  }
  func.func @transform_8(%arg0: i32) -> (i32, i32, i32) {
    %c0_i32 = arith.constant 0 : i32
    %c0_i32_0 = arith.constant 0 : i32
    %c0_i32_1 = arith.constant 0 : i32
    %c0_i32_2 = arith.constant 0 : i32
    return %c0_i32, %c0_i32_0, %c0_i32_1 : i32, i32, i32
  }
  func.func @transform_9(%arg0: i32) -> (i32, i32) {
    %c0_i32 = arith.constant 0 : i32
    %c0_i32_0 = arith.constant 0 : i32
    %c0_i32_1 = arith.constant 0 : i32
    return %c0_i32, %c0_i32_0 : i32, i32
  }
  func.func @transform_10(%arg0: i32) -> (i32, i32) {
    %c0_i32 = arith.constant 0 : i32
    %c0_i32_0 = arith.constant 0 : i32
    %c0_i32_1 = arith.constant 0 : i32
    return %c0_i32, %c0_i32_0 : i32, i32
  }
  func.func @transform_11(%arg0: i32) -> (i32, i32) {
    %c0_i32 = arith.constant 0 : i32
    %c0_i32_0 = arith.constant 0 : i32
    %c0_i32_1 = arith.constant 0 : i32
    return %c0_i32, %c0_i32_0 : i32, i32
  }
  func.func @transform_12(%arg0: i32) -> (i32, i32) {
    %c0_i32 = arith.constant 0 : i32
    %c0_i32_0 = arith.constant 0 : i32
    %c0_i32_1 = arith.constant 0 : i32
    return %c0_i32, %c0_i32_0 : i32, i32
  }
  func.func @transform_13(%arg0: i32) -> (i32, i32) {
    %c0_i32 = arith.constant 0 : i32
    %c0_i32_0 = arith.constant 0 : i32
    %c0_i32_1 = arith.constant 0 : i32
    return %c0_i32, %c0_i32_0 : i32, i32
  }
  func.func @transform_14(%arg0: i32) -> (i32, i32) {
    %c0_i32 = arith.constant 0 : i32
    %c0_i32_0 = arith.constant 0 : i32
    %c0_i32_1 = arith.constant 0 : i32
    return %c0_i32, %c0_i32_0 : i32, i32
  }
  func.func @transform_15(%arg0: i32) -> (i32, i32) {
    %c0_i32 = arith.constant 0 : i32
    %c0_i32_0 = arith.constant 0 : i32
    %c0_i32_1 = arith.constant 0 : i32
    return %c0_i32, %c0_i32_0 : i32, i32
  }
  func.func @transform_16(%arg0: i32) -> (i32, i32) {
    %c0_i32 = arith.constant 0 : i32
    %c0_i32_0 = arith.constant 0 : i32
    %c0_i32_1 = arith.constant 0 : i32
    return %c0_i32, %c0_i32_0 : i32, i32
  }
  func.func @transform_17(%arg0: i32) -> (i32, i32) {
    %c0_i32 = arith.constant 0 : i32
    %c0_i32_0 = arith.constant 0 : i32
    %c0_i32_1 = arith.constant 0 : i32
    return %c0_i32, %c0_i32_0 : i32, i32
  }
  func.func @transform_18(%arg0: i32) -> (i32, i32) {
    %c0_i32 = arith.constant 0 : i32
    %c0_i32_0 = arith.constant 0 : i32
    %c0_i32_1 = arith.constant 0 : i32
    return %c0_i32, %c0_i32_0 : i32, i32
  }
  func.func @transform_19(%arg0: i32) -> (i32, i32, i32, i32, i32) {
    %c0_i32 = arith.constant 0 : i32
    %c0_i32_0 = arith.constant 0 : i32
    %c0_i32_1 = arith.constant 0 : i32
    %c0_i32_2 = arith.constant 0 : i32
    %c0_i32_3 = arith.constant 0 : i32
    %c0_i32_4 = arith.constant 0 : i32
    return %c0_i32, %c0_i32_0, %c0_i32_1, %c0_i32_2, %c0_i32_3 : i32, i32, i32, i32, i32
  }
}

</mosaic_0001>

<bundles_post_ra>
// kernel: tpu_custom_call.1
= control target key start
LH: loop header
LB: loop body
LE: loop exit
PB: predicated region body
PF: predicated region fallthrough
CT: control target
= control target key end

     0   :  { %s5090_s0 = inlined_call_operand.vmem [shape: f32[16,32], index: 0, kind: input, shape index: {}]   ;;  %s5091_s1 = inlined_call_operand.vmem [shape: f32[2,8,8], index: 1, kind: input, shape index: {}]   ;;  %s5092_s2 = inlined_call_operand.vmem [shape: f32[2,32,16], index: 2, kind: input, shape index: {}]   ;;  %s5093_s3 = inlined_call_operand.vmem [shape: f32[2,1,16], index: 3, kind: input, shape index: {}]   ;;  %s5094_s4 = inlined_call_operand.vmem [shape: f32[2,32,16], index: 4, kind: input, shape index: {}]   ;;  %s5095_s5 = inlined_call_operand.vmem [shape: f32[2,1,16], index: 5, kind: input, shape index: {}]   ;;  %s5096_s6 = inlined_call_operand.vmem [shape: f32[2,32,16], index: 6, kind: input, shape index: {}]   ;;  %s5097_s7 = inlined_call_operand.vmem [shape: f32[2,1,16], index: 7, kind: input, shape index: {}]   ;;  %s5098_s8 = inlined_call_operand.vmem [shape: f32[2,16,32], index: 8, kind: input, shape index: {}]   ;;  %s5099_s9 = inlined_call_operand.vmem [shape: f32[1,32], index: 9, kind: input, shape index: {}]   ;;  %s5100_s10 = inlined_call_operand.vmem [shape: f32[1,32], index: 10, kind: input, shape index: {}]   ;;  %s5101_s11 = inlined_call_operand.vmem [shape: f32[1,32], index: 11, kind: input, shape index: {}]   ;;  %s5102_s12 = inlined_call_operand.vmem [shape: f32[32,64], index: 12, kind: input, shape index: {}]   ;;  %s5103_s13 = inlined_call_operand.vmem [shape: f32[1,64], index: 13, kind: input, shape index: {}]   ;;  %s5104_s14 = inlined_call_operand.vmem [shape: f32[64,32], index: 14, kind: input, shape index: {}]   ;;  %s5105_s15 = inlined_call_operand.vmem [shape: f32[1,32], index: 15, kind: input, shape index: {}]   ;;  %s5106_s16 = inlined_call_operand.vmem [shape: f32[1,32], index: 16, kind: input, shape index: {}]   ;;  %s5107_s17 = inlined_call_operand.vmem [shape: f32[1,32], index: 17, kind: input, shape index: {}]   ;;  %s5108_s18 = inlined_call_operand.hbm [shape: f32[16,32], index: 18, kind: output, shape index: {0}]   ;;  %s5109_s19 = inlined_call_operand.hbm [shape: f32[2,2,2,8,8], index: 19, kind: output, shape index: {1}]  }
   0x1   :  { %5116 = sst [smem:[#allocation8_spill]] %s5090_s0 }
   0x2   :  { %5117 = sst [smem:[#allocation9_spill]] %s5091_s1 }
   0x3   :  { %5118 = sst [smem:[#allocation10_spill]] %s5092_s2 }
   0x4   :  { %5119 = sst [smem:[#allocation11_spill]] %s5093_s3 }
   0x5   :  { %25 = vsyncpa [#allocation3], 0  ;;  %s5120_s20 = sld [smem:[#allocation10_spill]]  ;;  %vm134_vm0 = vcmask 261120  }
   0x6   :  { %s5121_s23 = sld [smem:[#allocation8_spill]] }
   0xb   :  { %v4310_v0 = vld [vmem:[%s5120_s20 + $0x18] sm:$0xff]  ;;  %v4315_v1 = vld [vmem:[%s5120_s20 + $0x10] sm:$0xff]  ;;  %v4327_v3 = vld [vmem:[%s5120_s20 + $0x8] sm:$0xff] }
   0xc   :  { %3767 = vmatprep.subr.mxu0 %v4310_v0  ;;  %v4321_v2 = vld [vmem:[%s5121_s23] sm:$0xff] }
   0xd   :  { %3768 = vmatpush3.msra.mxu0 %v4310_v0  ;;  %3775 = vmatprep.mubr.msk.f32.mxu0 %vm134_vm0, %v4321_v2 }
   0xe   :  { %3769 = vmatprep.subr.mxu0 %v4315_v1  ;;  %3786 = vmatprep.mubr.msk.f32.mxu1 %vm134_vm0, %v4321_v2 }
   0xf   :  { %26 = vsyncpa [#allocation5], 0  ;;  %3770 = vmatpush3.msra.mxu0 %v4315_v1  ;;  %v4338_v4 = vld [vmem:[%s5120_s20] sm:$0xff]  ;;  %v4345_v5 = vld [vmem:[%s5121_s23 + $0x8] sm:$0xff]  ;;  %v5114_v14 = vmov 0.0   ;;  %vm4202_vm1 = vmmov 0  }
  0x10   :  { %3771 = vmatprep.subr.mxu0 %v4327_v3  ;;  %v4350_v6 = vld [vmem:[%s5094_s4 + $0x18] sm:$0xff]  ;;  %v4357_v7 = vld [vmem:[%s5094_s4 + $0x10] sm:$0xff]  ;;  %v4366_v8 = vld [vmem:[%s5094_s4 + $0x8] sm:$0xff]  ;;  %vm621_vm2 = vcmask 130048   ;;  %s5122_s2 = sld [smem:[#allocation11_spill]]  ;;  %vm698_vm3 = vcmask 64512  }
  0x11   :  { %3772 = vmatpush3.msra.mxu0 %v4327_v3  ;;  %v4375_v9 = vld [vmem:[%s5094_s4] sm:$0xff]  ;;  %v4388_v10 = vld [vmem:[%s5096_s6 + $0x18] sm:$0xff]  ;;  %v4395_v11 = vld [vmem:[%s5096_s6 + $0x10] sm:$0xff]  ;;  %s5123_s28 = sld [smem:[#allocation9_spill]]  ;;  %vm1718_vm4 = vcmask 523264  }
  0x12   :  { %3773 = vmatprep.subr.mxu0 %v4338_v4  ;;  %v4400_v12 = vld [vmem:[%s5096_s6 + $0x8] sm:$0xff]  ;;  %v4409_v13 = vld [vmem:[%s5096_s6] sm:$0xff]  ;;  %v4451_v27 = vld [vmem:[%s5120_s20 + $0x38] sm:$0xff] }
  0x13   :  { %3774 = vmatpush3.msra.mxu0 %v4338_v4  ;;  %v4425_v18 = vld [vmem:[%s5095_s5] ss:$0 sm:$0xff]  ;;  %v4456_v28 = vld [vmem:[%s5120_s20 + $0x30] sm:$0xff]  ;;  %3778 = vmatprep.subr.mxu1 %v4451_v27  ;;  %v4463_v29 = vld [vmem:[%s5120_s20 + $0x28] sm:$0xff] }
  0x14   :  { %3776 = vmatmul.mubr.msk.f32.vlgmr.msra.gmra.mxu0 %vm134_vm0, %v4345_v5  ;;  %3789 = vmatprep.subr.mxu0 %v4350_v6  ;;  %v4444_v24 = vld [vmem:[%s5097_s7] ss:$0 sm:$0xff]  ;;  %v4477_v31 = vld [vmem:[%s5094_s4 + $0x38] sm:$0xff]  ;;  %v4484_v32 = vld [vmem:[%s5094_s4 + $0x30] sm:$0xff] }
  0x15   :  { %3790 = vmatpush3.msra.mxu0 %v4350_v6  ;;  %3797 = vmatprep.mubr.msk.f32.mxu0 %vm134_vm0, %v4321_v2  ;;  %v4470_v30 = vld [vmem:[%s5120_s20 + $0x20] sm:$0xff]  ;;  %v4493_v33 = vld [vmem:[%s5094_s4 + $0x28] sm:$0xff]  ;;  %v4548_v56 = vld [vmem:[%s5096_s6 + $0x38] sm:$0xff] }
  0x16   :  { %3791 = vmatprep.subr.mxu0 %v4357_v7  ;;  %v4430_v20 = vld [vmem:[%s5122_s2] ss:$0 sm:$0xff]  ;;  %3779 = vmatpush3.msra.mxu1 %v4451_v27  ;;  %v4527_v49 = vld [vmem:[%s5095_s5 + $0x1] ss:$0 sm:$0xff]  ;;  %v4553_v57 = vld [vmem:[%s5096_s6 + $0x30] sm:$0xff] }
  0x17   :  { %3792 = vmatpush3.msra.mxu0 %v4357_v7  ;;  %3780 = vmatprep.subr.mxu1 %v4456_v28  ;;  %v4502_v34 = vld [vmem:[%s5094_s4 + $0x20] sm:$0xff]  ;;  %v4560_v58 = vld [vmem:[%s5096_s6 + $0x28] sm:$0xff] }
  0x18   :  { %3793 = vmatprep.subr.mxu0 %v4366_v8  ;;  %3781 = vmatpush3.msra.mxu1 %v4456_v28  ;;  %v4515_v35 = vld [vmem:[%s5123_s28] sm:$0xff] }
  0x19   :  { %3794 = vmatpush3.msra.mxu0 %v4366_v8  ;;  %3782 = vmatprep.subr.mxu1 %v4463_v29  ;;  %v4533_v54 = vld [vmem:[%s5122_s2 + $0x1] ss:$0 sm:$0xff] }
  0x1a   :  { %3795 = vmatprep.subr.mxu0 %v4375_v9  ;;  %3783 = vmatpush3.msra.mxu1 %v4463_v29  ;;  %v4567_v59 = vld [vmem:[%s5096_s6 + $0x20] sm:$0xff] }
  0x1b   :  { %3796 = vmatpush3.msra.mxu0 %v4375_v9  ;;  %3784 = vmatprep.subr.mxu1 %v4470_v30 }
  0x1c   :  { %3798 = vmatmul.mubr.msk.f32.vlgmr.msra.gmra.mxu0 %vm134_vm0, %v4345_v5  ;;  %3811 = vmatprep.subr.mxu0 %v4388_v10 }
  0x1d   :  { %3819 = vmatprep.mubr.msk.f32.mxu0 %vm134_vm0, %v4321_v2  ;;  %3812 = vmatpush3.msra.mxu0 %v4388_v10 }
  0x1e   :  { %3813 = vmatprep.subr.mxu0 %v4395_v11  ;;  %3785 = vmatpush3.msra.mxu1 %v4470_v30 }
  0x1f   :  { %3814 = vmatpush3.msra.mxu0 %v4395_v11  ;;  %3800 = vmatprep.subr.mxu1 %v4477_v31 }
  0x20   :  { %3815 = vmatprep.subr.mxu0 %v4400_v12  ;;  %3787 = vmatmul.mubr.msk.f32.vlgmr.msra.gmra.mxu1 %vm134_vm0, %v4345_v5 }
  0x21   :  { %3816 = vmatpush3.msra.mxu0 %v4400_v12  ;;  %3801 = vmatpush3.msra.mxu1 %v4477_v31 }
  0x22   :  { %3817 = vmatprep.subr.mxu0 %v4409_v13  ;;  %3808 = vmatprep.mubr.msk.f32.mxu1 %vm134_vm0, %v4321_v2 }
  0x23   :  { %3818 = vmatpush3.msra.mxu0 %v4409_v13  ;;  %3802 = vmatprep.subr.mxu1 %v4484_v32 }
  0x24   :  { %3820 = vmatmul.mubr.msk.f32.vlgmr.msra.gmra.mxu0 %vm134_vm0, %v4345_v5  ;;  %3833 = vmatprep.subr.mxu0 %v5114_v14 }
  0x25   :  { %3835 = vmatprep.mubr.msk.f32.mxu0 %vm4202_vm1, %v5114_v14  ;;  %3803 = vmatpush3.msra.mxu1 %v4484_v32 }
  0x26   :  { %3804 = vmatprep.subr.mxu1 %v4493_v33 }
  0x27   :  { %3805 = vmatpush3.msra.mxu1 %v4493_v33 }
  0x28   :  { %3806 = vmatprep.subr.mxu1 %v4502_v34 }
  0x29   :  { %3807 = vmatpush3.msra.mxu1 %v4502_v34 }
  0x2a   :  { %3809 = vmatmul.mubr.msk.f32.vlgmr.msra.gmra.mxu1 %vm134_vm0, %v4345_v5  ;;  %3822 = vmatprep.subr.mxu1 %v4548_v56 }
  0x2b   :  { %3830 = vmatprep.mubr.msk.f32.mxu1 %vm134_vm0, %v4321_v2  ;;  %3823 = vmatpush3.msra.mxu1 %v4548_v56 }
  0x2c   :  { %3824 = vmatprep.subr.mxu1 %v4553_v57 }
  0x2d   :  { %3825 = vmatpush3.msra.mxu1 %v4553_v57 }
  0x2e   :  { %3826 = vmatprep.subr.mxu1 %v4560_v58 }
  0x2f   :  { %3827 = vmatpush3.msra.mxu1 %v4560_v58 }
  0x30   :  { %3828 = vmatprep.subr.mxu1 %v4567_v59 }
  0x31   :  { %3829 = vmatpush3.msra.mxu1 %v4567_v59 }
  0x32   :  { %3831 = vmatmul.mubr.msk.f32.vlgmr.msra.gmra.mxu1 %vm134_vm0, %v4345_v5  ;;  %3848 = vmatprep.subr.mxu1 %v5114_v14 }
  0x33   :  { %3850 = vmatprep.mubr.msk.f32.mxu1 %vm4202_vm1, %v5114_v14 }
  0xd4   :  { %v4418_v15 = vpop.f32.mrf.mxu0 }
  0xd6   :  { %v207_v16 = vpop.f32.mrf.mxu0 }
  0xd7   :  { %v208_v22 = vadd.f32 %v4430_v20, %v207_v16 }
  0xdc   :  { %v4420_v17 = vpop.f32.mrf.mxu0 }
  0xde   :  { %v369_v19 = vpop.f32.mrf.mxu0 }
  0xdf   :  { %v370_v21 = vadd.f32 %v4425_v18, %v369_v19 }
  0xe0   :  { %v4520_v46 = vpop.f32.mrf.mxu1 }
  0xe1   :  { %3834 = vmatpush3.xpose.msk.msra.mxu0 %vm621_vm2, %v370_v21 }
  0xe2   :  { %3838 = vmatprep.subr.mxu0 %v5114_v14  ;;  %v288_v47 = vpop.f32.mrf.mxu1 }
  0xe3   :  { %v289_v55 = vadd.f32 %v4533_v54, %v288_v47  ;;  %v4607_v47 = vld [vmem:[%s5098_s8 + $0x8] sm:$0xff] }
  0xe4   :  { %3836 = vmatmul.mubr.msk.f32.vlgmr.msra.gmra.mxu0 %vm621_vm2, %v208_v22  ;;  %v4439_v23 = vpop.f32.mrf.mxu0 }
  0xe5   :  { %3840 = vmatprep.mubr.msk.f32.mxu0 %vm4202_vm1, %v5114_v14 }
  0xe6   :  { %v531_v25 = vpop.f32.mrf.mxu0 }
  0xe7   :  { %v532_v26 = vadd.f32 %v4444_v24, %v531_v25 }
  0xe9   :  { %3839 = vmatpush3.msra.mxu0 %v532_v26 }
  0xea   :  { %3843 = vmatprep.subr.mxu0 %v5114_v14  ;;  %v4522_v48 = vpop.f32.mrf.mxu1 }
  0xec   :  { %v450_v50 = vpop.f32.mrf.mxu1 }
  0xed   :  { %v451_v52 = vadd.f32 %v4527_v49, %v450_v50  ;;  %v4614_v50 = vld [vmem:[%s5098_s8] sm:$0xff] }
 0x1a4   :  { %v694_v36 = vpop.f32.mrf.mxu0 }
 0x1a5   :  { %v695_v37 = vadd.f32 %v694_v36, %v4515_v35 }
 0x1a6   :  { %v3837_v38 = vpop.f32.mrf.mxu0 }
 0x1a7   :  { %v699_v39 = vsel %vm698_vm3, %v695_v37, -inf  ;;  %v4586_v38 = vld [vmem:[%s5097_s7 + $0x1] ss:$0 sm:$0xff] }
 0x1a8   :  { %700 = vmax.xlane.f32.xlu0 %v699_v39 }
 0x231   :  { %v701_v40 = vpop.xlane.xlu0 %700 }
 0x232   :  { %v702_v41 = vsub.f32 %v695_v37, %v701_v40  ;;  %v4581_v37 = vpop.f32.mrf.mxu1 }
 0x234   :  { %v703_v42 = vmul.f32 1.442695, %v702_v41  ;;  %v612_v39 = vpop.f32.mrf.mxu1  ;;  %v4593_v41 = vld [vmem:[%s5098_s8 + $0x18] sm:$0xff] }
 0x235   :  { %v613_v40 = vadd.f32 %v4586_v38, %v612_v39 }
 0x236   :  { %4101 = vpow2.f32 %v703_v42  ;;  %v4598_v42 = vld [vmem:[%s5098_s8 + $0x10] sm:$0xff] }
 0x237   :  { %3849 = vmatpush3.msra.mxu1 %v613_v40 }
 0x238   :  { %3860 = vmatprep.subr.mxu1 %v5114_v14 }
 0x243   :  { %v4102_v43 = vpop.eup %4101 }
 0x244   :  { %v705_v44 = vsel %vm698_vm3, %v4102_v43, 0.0 }
 0x245   :  { %706 = vadd.xlane.f32.xlu0 %v705_v44 }
 0x2ce   :  { %v707_v45 = vpop.xlane.xlu0 %706 }
 0x2cf   :  { %4103 = vrcp.f32 %v707_v45 }
 0x2dc   :  { %v4104_v51 = vpop.eup %4103 }
 0x2dd   :  { %v709_v53 = vmul.f32 %v4104_v51, %v4102_v43  ;;  %v537_v51 = vadd.f32 %v4439_v23, %v4444_v24 }
 0x2df   :  { %710 = vst.msk [vmem:[#allocation4] sm:$0xff] %vm698_vm3, %v709_v53  ;;  %3841 = vmatmul.mubr.msk.f32.vlgmr.msra.gmra.mxu0 %vm698_vm3, %v709_v53 }
 0x2e0   :  { %3844 = vmatpush3.xpose.msk.msra.mxu0 %vm621_vm2, %v451_v52  ;;  %3845 = vmatprep.mubr.msk.f32.mxu0 %vm4202_vm1, %v5114_v14  ;;  %v375_v52 = vadd.f32 %v4420_v17, %v4425_v18 }
 0x2e1   :  { %3853 = vmatprep.subr.mxu0 %v5114_v14 }
 0x2e3   :  { %3846 = vmatmul.mubr.msk.f32.vlgmr.msra.gmra.mxu0 %vm621_vm2, %v289_v55  ;;  %v213_v55 = vadd.f32 %v4418_v15, %v4430_v20 }
 0x2e4   :  { %3857 = vmatprep.mubr.msk.f32.mxu0 %vm4202_vm1, %v5114_v14  ;;  %3854 = vmatpush3.msra.mxu0 %v4593_v41 }
 0x2e5   :  { %3855 = vmatprep.subr.mxu0 %v5114_v14 }
 0x2e6   :  { %3856 = vmatpush3.msra.mxu0 %v4598_v42 }
 0x2e7   :  { %3867 = vmatprep.subr.mxu0 %v5114_v14 }
 0x39f   :  { %v780_v60 = vpop.f32.mrf.mxu0 }
 0x3a1   :  { %v3842_v61 = vpop.f32.mrf.mxu0 }
 0x3a3   :  { %v856_v62 = vpop.f32.mrf.mxu0 }
 0x3a4   :  { %v857_v63 = vadd.f32 %v856_v62, %v4515_v35  ;;  %v294_v62 = vadd.f32 %v4520_v46, %v4533_v54 }
 0x3a5   :  { %v3847_v16 = vpop.f32.mrf.mxu0 }
 0x3a6   :  { %v860_v19 = vsel %vm698_vm3, %v857_v63, -inf }
 0x3a7   :  { %861 = vmax.xlane.f32.xlu1 %v860_v19 }
 0x430   :  { %v862_v21 = vpop.xlane.xlu1 %861 }
 0x431   :  { %v863_v22 = vsub.f32 %v857_v63, %v862_v21  ;;  %v4655_v63 = vld [vmem:[%s5123_s28 + $0x8] sm:$0xff] }
 0x433   :  { %v864_v25 = vmul.f32 1.442695, %v863_v22 }
 0x435   :  { %4105 = vpow2.f32 %v864_v25 }
 0x442   :  { %v4106_v26 = vpop.eup %4105 }
 0x443   :  { %v866_v36 = vsel %vm698_vm3, %v4106_v26, 0.0 }
 0x444   :  { %867 = vadd.xlane.f32.xlu1 %v866_v36 }
 0x4cd   :  { %v868_v43 = vpop.xlane.xlu1 %867 }
 0x4ce   :  { %4107 = vrcp.f32 %v868_v43 }
 0x4db   :  { %v4108_v44 = vpop.eup %4107 }
 0x4dc   :  { %v870_v45 = vmul.f32 %v4108_v44, %v4106_v26 }
 0x4de   :  { %872 = vst.msk [vmem:[#allocation4 + $0x8] sm:$0xff] %vm698_vm3, %v870_v45  ;;  %3851 = vmatmul.mubr.msk.f32.vlgmr.msra.gmra.mxu1 %vm698_vm3, %v870_v45 }
 0x4df   :  { %3861 = vmatpush3.msra.mxu1 %v4607_v47  ;;  %3864 = vmatprep.mubr.msk.f32.mxu1 %vm4202_vm1, %v5114_v14 }
 0x4e0   :  { %3862 = vmatprep.subr.mxu1 %v5114_v14 }
 0x4e1   :  { %3863 = vmatpush3.msra.mxu1 %v4614_v50 }
 0x4e2   :  { %3872 = vmatprep.subr.mxu1 %v5114_v14  ;;  %3865 = vmatmul.mubr.msk.f32.vlgmr.msra.gmra.mxu1 %vm621_vm2, %v780_v60  ;;  %v456_v60 = vadd.f32 %v4522_v48, %v4527_v49 }
 0x4e3   :  { %3873 = vmatpush3.msra.mxu1 %v537_v51  ;;  %3874 = vmatprep.mubr.msk.f32.mxu1 %vm4202_vm1, %v5114_v14 }
 0x4e4   :  { %3882 = vmatprep.subr.mxu1 %v5114_v14 }
 0x59e   :  { %v942_v53 = vpop.f32.mrf.mxu1 }
 0x59f   :  { %3858 = vmatmul.mubr.msk.f32.vlgmr.msra.gmra.mxu0 %vm621_vm2, %v942_v53  ;;  %v4664_v53 = vld [vmem:[%s5099_s9] ss:$0 sm:$0xff] }
 0x5a0   :  { %3868 = vmatpush3.xpose.msk.msra.mxu0 %vm621_vm2, %v375_v52  ;;  %v3852_v23 = vpop.f32.mrf.mxu1  ;;  %3869 = vmatprep.mubr.msk.f32.mxu0 %vm4202_vm1, %v5114_v14 }
 0x5a1   :  { %3877 = vmatprep.subr.mxu0 %v5114_v14 }
 0x5a2   :  { %v1088_v61 = vpop.f32.mrf.mxu1 }
 0x5a3   :  { %3870 = vmatmul.mubr.msk.f32.vlgmr.msra.gmra.mxu0 %vm621_vm2, %v213_v55 }
 0x5a4   :  { %3878 = vmatpush3.xpose.msk.msra.mxu0 %vm621_vm2, %v456_v60  ;;  %v3866_v17 = vpop.f32.mrf.mxu1  ;;  %3879 = vmatprep.mubr.msk.f32.mxu0 %vm4202_vm1, %v5114_v14 }
 0x5a5   :  { %3887 = vmatprep.subr.mxu0 %v5114_v14 }
 0x5a7   :  { %3880 = vmatmul.mubr.msk.f32.vlgmr.msra.gmra.mxu0 %vm621_vm2, %v294_v62 }
 0x5a8   :  { %3888 = vmatpush3.msra.mxu0 %v4593_v41  ;;  %3891 = vmatprep.mubr.msk.f32.mxu0 %vm4202_vm1, %v5114_v14 }
 0x5a9   :  { %3889 = vmatprep.subr.mxu0 %v5114_v14 }
 0x5aa   :  { %3890 = vmatpush3.msra.mxu0 %v4598_v42 }
 0x65f   :  { %v1015_v15 = vpop.f32.mrf.mxu0 }
 0x660   :  { %v1089_v52 = vadd.f32 %v1088_v61, %v1015_v15 }
 0x661   :  { %v3859_v48 = vpop.f32.mrf.mxu0 }
 0x662   :  { %v1568_v23 = vadd.f32 %v4664_v53, %v1089_v52  ;;  %v4689_v52 = vld [vmem:[%s5100_s10] ss:$0 sm:$0xff] }
 0x663   :  { %v1164_v46 = vpop.f32.mrf.mxu0 }
 0x664   :  { %v1165_v16 = vadd.f32 %v4655_v63, %v1164_v46  ;;  %v1570_v17 = vadd.f32 %v1568_v23, %v4321_v2 }
 0x665   :  { %v3871_v19 = vpop.f32.mrf.mxu0 }
 0x666   :  { %v1168_v21 = vsel %vm698_vm3, %v1165_v16, -inf  ;;  %v1572_v48 = vsel %vm134_vm0, %v1570_v17, 0.0 }
 0x667   :  { %1169 = vmax.xlane.f32.xlu0 %v1168_v21  ;;  %v1326_v22 = vpop.f32.mrf.mxu0 }
 0x668   :  { %v1327_v25 = vadd.f32 %v4655_v63, %v1326_v22 }
 0x669   :  { %v3881_v26 = vpop.f32.mrf.mxu0 }
 0x66a   :  { %v1330_v36 = vsel %vm698_vm3, %v1327_v25, -inf }
 0x66b   :  { %1331 = vmax.xlane.f32.xlu1 %v1330_v36  ;;  %v618_v36 = vadd.f32 %v4581_v37, %v4586_v38 }
 0x6f0   :  { %v1170_v39 = vpop.xlane.xlu0 %1169 }
 0x6f1   :  { %v1171_v40 = vsub.f32 %v1165_v16, %v1170_v39 }
 0x6f3   :  { %v1172_v43 = vmul.f32 1.442695, %v1171_v40 }
 0x6f4   :  { %v1332_v44 = vpop.xlane.xlu1 %1331 }
 0x6f5   :  { %4109 = vpow2.f32 %v1172_v43  ;;  %v1333_v45 = vsub.f32 %v1327_v25, %v1332_v44 }
 0x6f7   :  { %v1334_v51 = vmul.f32 1.442695, %v1333_v45 }
 0x6f9   :  { %4111 = vpow2.f32 %v1334_v51 }
 0x702   :  { %v4110_v55 = vpop.eup %4109 }
 0x703   :  { %v1174_v60 = vsel %vm698_vm3, %v4110_v55, 0.0 }
 0x704   :  { %1175 = vadd.xlane.f32.xlu0 %v1174_v60  ;;  %v4696_v60 = vld [vmem:[%s5101_s11] ss:$0 sm:$0xff] }
 0x706   :  { %v4112_v62 = vpop.eup %4111 }
 0x707   :  { %v1336_v46 = vsel %vm698_vm3, %v4112_v62, 0.0 }
 0x708   :  { %1573 = vadd.xlane.f32.xlu0 %v1572_v48  ;;  %1337 = vadd.xlane.f32.xlu1 %v1336_v46 }
 0x78d   :  { %v1176_v61 = vpop.xlane.xlu0 %1175 }
 0x78e   :  { %4113 = vrcp.f32 %v1176_v61 }
 0x791   :  { %v1574_v15 = vpop.xlane.xlu0 %1573  ;;  %v1338_v16 = vpop.xlane.xlu1 %1337 }
 0x792   :  { %v1579_v19 = vmul.f32 0.03125, %v1574_v15  ;;  %4115 = vrcp.f32 %v1338_v16 }
 0x794   :  { %v1581_v21 = vsub.f32 %v1570_v17, %v1579_v19 }
 0x796   :  { %v1583_v22 = vmul.f32 %v1581_v21, %v1581_v21 }
 0x798   :  { %v1585_v25 = vsel %vm134_vm0, %v1583_v22, 0.0 }
 0x799   :  { %1586 = vadd.xlane.f32.xlu0 %v1585_v25 }
 0x79b   :  { %v4114_v2 = vpop.eup %4113 }
 0x79c   :  { %v1178_v26 = vmul.f32 %v4114_v2, %v4110_v55 }
 0x79e   :  { %1180 = vst.msk [vmem:[#allocation4 + $0x10] sm:$0xff] %vm698_vm3, %v1178_v26  ;;  %3875 = vmatmul.mubr.msk.f32.vlgmr.msra.gmra.mxu1 %vm698_vm3, %v1178_v26 }
 0x79f   :  { %v4116_v39 = vpop.eup %4115  ;;  %3883 = vmatpush3.msra.mxu1 %v618_v36  ;;  %3884 = vmatprep.mubr.msk.f32.mxu1 %vm4202_vm1, %v5114_v14 }
 0x7a0   :  { %v1340_v40 = vmul.f32 %v4116_v39, %v4112_v62  ;;  %3894 = vmatprep.subr.mxu1 %v5114_v14 }
 0x7a2   :  { %1342 = vst.msk [vmem:[#allocation4 + $0x18] sm:$0xff] %vm698_vm3, %v1340_v40  ;;  %3885 = vmatmul.mubr.msk.f32.vlgmr.msra.gmra.mxu1 %vm698_vm3, %v1340_v40 }
 0x7a3   :  { %3895 = vmatpush3.msra.mxu1 %v4607_v47  ;;  %3898 = vmatprep.mubr.msk.f32.mxu1 %vm4202_vm1, %v5114_v14 }
 0x7a4   :  { %3896 = vmatprep.subr.mxu1 %v5114_v14 }
 0x7a5   :  { %3897 = vmatpush3.msra.mxu1 %v4614_v50 }
 0x822   :  { %v1587_v37 = vpop.xlane.xlu0 %1586 }
 0x823   :  { %v1591_v43 = vmul.f32 0.03125, %v1587_v37 }
 0x825   :  { %v1593_v44 = vadd.f32 1e-12, %v1591_v43  ;;  %v4711_v43 = vld [vmem:[%s5102_s12 + $0x18] sm:$0xff] }
 0x826   :  { %3901 = vmatprep.subr.mxu0 %v4711_v43 }
 0x827   :  { %4117 = vrsqrt.f32 %v1593_v44  ;;  %v4723_v44 = vld [vmem:[%s5102_s12 + $0x8] sm:$0xff] }
 0x834   :  { %v4118_v45 = vpop.eup %4117 }
 0x835   :  { %v1597_v51 = vmul.f32 %v4118_v45, %v1581_v21  ;;  %v4730_v45 = vld [vmem:[%s5102_s12] sm:$0xff] }
 0x837   :  { %v1605_v55 = vmul.f32 %v4689_v52, %v1597_v51 }
 0x839   :  { %v4699_v48 = vadd.f32 %v4696_v60, %v1605_v55 }
 0x85e   :  { %v1250_v23 = vpop.f32.mrf.mxu1 }
 0x85f   :  { %3899 = vmatmul.mubr.msk.f32.vlgmr.msra.gmra.mxu1 %vm621_vm2, %v1250_v23 }
 0x860   :  { %v3876_v17 = vpop.f32.mrf.mxu1 }
 0x862   :  { %v1412_v62 = vpop.f32.mrf.mxu1 }
 0x863   :  { %3892 = vmatmul.mubr.msk.f32.vlgmr.msra.gmra.mxu0 %vm621_vm2, %v1412_v62 }
 0x864   :  { %v3886_v46 = vpop.f32.mrf.mxu1  ;;  %3909 = vmatprep.mubr.msk.f32.mxu0 %vm134_vm0, %v4699_v48  ;;  %3902 = vmatpush3.msra.mxu0 %v4711_v43 }
 0x91f   :  { %v1558_v61 = vpop.f32.mrf.mxu1 }
 0x921   :  { %v3900_v15 = vpop.f32.mrf.mxu1 }
 0x922   :  { %v4754_v15 = vld [vmem:[%s5104_s14 + $0x38] sm:$0xff] }
 0x923   :  { %v1485_v16 = vpop.f32.mrf.mxu0  ;;  %3912 = vmatprep.subr.mxu1 %v4754_v15 }
 0x924   :  { %v1559_v19 = vadd.f32 %v1558_v61, %v1485_v16  ;;  %3913 = vmatpush3.msra.mxu1 %v4754_v15  ;;  %v4789_v16 = vld [vmem:[%s5104_s14 + $0x10] sm:$0xff] }
 0x925   :  { %v3893_v21 = vpop.f32.mrf.mxu0 }
 0x926   :  { %v1569_v22 = vadd.f32 %v4664_v53, %v1559_v19  ;;  %v4796_v19 = vld [vmem:[%s5104_s14 + $0x8] sm:$0xff]  ;;  %v4802_v21 = vld [vmem:[%s5104_s14] sm:$0xff] }
 0x928   :  { %v1571_v25 = vadd.f32 %v1569_v22, %v4345_v5  ;;  %v4718_v5 = vld [vmem:[%s5102_s12 + $0x10] sm:$0xff]  ;;  %v4811_v22 = vld [vmem:[%s5103_s13] ss:$0 sm:$0xff] }
 0x929   :  { %3903 = vmatprep.subr.mxu0 %v4718_v5 }
 0x92a   :  { %v1575_v2 = vsel %vm134_vm0, %v1571_v25, 0.0  ;;  %3904 = vmatpush3.msra.mxu0 %v4718_v5 }
 0x92b   :  { %1576 = vadd.xlane.f32.xlu1 %v1575_v2  ;;  %3905 = vmatprep.subr.mxu0 %v4723_v44 }
 0x92c   :  { %3906 = vmatpush3.msra.mxu0 %v4723_v44 }
 0x92d   :  { %3907 = vmatprep.subr.mxu0 %v4730_v45 }
 0x92e   :  { %3908 = vmatpush3.msra.mxu0 %v4730_v45 }
 0x92f   :  { %3931 = vmatprep.subr.mxu0 %v4310_v0 }
 0x9b4   :  { %v1577_v26 = vpop.xlane.xlu1 %1576 }
 0x9b5   :  { %v1580_v36 = vmul.f32 0.03125, %v1577_v26 }
 0x9b7   :  { %v1582_v39 = vsub.f32 %v1571_v25, %v1580_v36 }
 0x9b9   :  { %v1584_v40 = vmul.f32 %v1582_v39, %v1582_v39 }
 0x9bb   :  { %v1588_v37 = vsel %vm134_vm0, %v1584_v40, 0.0 }
 0x9bc   :  { %1589 = vadd.xlane.f32.xlu1 %v1588_v37 }
 0xa45   :  { %v1590_v51 = vpop.xlane.xlu1 %1589 }
 0xa46   :  { %v1592_v23 = vmul.f32 0.03125, %v1590_v51 }
 0xa48   :  { %v1594_v55 = vadd.f32 1e-12, %v1592_v23 }
 0xa4a   :  { %4119 = vrsqrt.f32 %v1594_v55 }
 0xa57   :  { %v4120_v17 = vpop.eup %4119 }
 0xa58   :  { %v1598_v62 = vmul.f32 %v4120_v17, %v1582_v39 }
 0xa5a   :  { %v1606_v46 = vmul.f32 %v4689_v52, %v1598_v62 }
 0xa5c   :  { %v4739_v61 = vadd.f32 %v4696_v60, %v1606_v46 }
 0xa5e   :  { %3910 = vmatmul.mubr.msk.f32.vlgmr.msra.gmra.mxu0 %vm134_vm0, %v4739_v61 }
 0xa5f   :  { %3932 = vmatpush3.msra.mxu0 %v4310_v0  ;;  %v4761_v0 = vld [vmem:[%s5104_s14 + $0x30] sm:$0xff] }
 0xa60   :  { %3933 = vmatprep.subr.mxu0 %v4315_v1  ;;  %3914 = vmatprep.subr.mxu1 %v4761_v0 }
 0xa61   :  { %3934 = vmatpush3.msra.mxu0 %v4315_v1  ;;  %3915 = vmatpush3.msra.mxu1 %v4761_v0  ;;  %v4768_v1 = vld [vmem:[%s5104_s14 + $0x28] sm:$0xff] }
 0xa62   :  { %3935 = vmatprep.subr.mxu0 %v4327_v3  ;;  %3916 = vmatprep.subr.mxu1 %v4768_v1 }
 0xa63   :  { %3936 = vmatpush3.msra.mxu0 %v4327_v3  ;;  %3917 = vmatpush3.msra.mxu1 %v4768_v1  ;;  %v4775_v3 = vld [vmem:[%s5104_s14 + $0x20] sm:$0xff] }
 0xa64   :  { %3937 = vmatprep.subr.mxu0 %v4338_v4  ;;  %3918 = vmatprep.subr.mxu1 %v4775_v3 }
 0xa65   :  { %3938 = vmatpush3.msra.mxu0 %v4338_v4  ;;  %3919 = vmatpush3.msra.mxu1 %v4775_v3  ;;  %v4782_v4 = vld [vmem:[%s5104_s14 + $0x18] sm:$0xff] }
 0xa66   :  { %3942 = vmatprep.subr.mxu0 %v4451_v27  ;;  %3920 = vmatprep.subr.mxu1 %v4782_v4 }
 0xa67   :  { %3921 = vmatpush3.msra.mxu1 %v4782_v4 }
 0xa68   :  { %3922 = vmatprep.subr.mxu1 %v4789_v16 }
 0xa69   :  { %3923 = vmatpush3.msra.mxu1 %v4789_v16 }
 0xa6a   :  { %3924 = vmatprep.subr.mxu1 %v4796_v19 }
 0xa6b   :  { %3925 = vmatpush3.msra.mxu1 %v4796_v19 }
 0xa6c   :  { %3926 = vmatprep.subr.mxu1 %v4802_v21 }
 0xa6d   :  { %3927 = vmatpush3.msra.mxu1 %v4802_v21 }
 0xa6e   :  { %3953 = vmatprep.subr.mxu1 %v4350_v6 }
 0xb1e   :  { %v3911_v25 = vpop.f32.mrf.mxu0 }
 0xb1f   :  { %v1699_v2 = vadd.f32 %v3911_v25, %v4811_v22 }
 0xb20   :  { %v1693_v26 = vpop.f32.mrf.mxu0 }
 0xb21   :  { %v1705_v36 = vmul.f32 0.70710677, %v1699_v2  ;;  %v1694_v39 = vadd.f32 %v4811_v22, %v1693_v26  ;;  %v1703_v62 = vmul.f32 0.5, %v1699_v2 }
 0xb23   :  { %4121 = verf.f32 %v1705_v36  ;;  %v1704_v40 = vmul.f32 0.70710677, %v1694_v39  ;;  %v1702_v55 = vmul.f32 0.5, %v1694_v39 }
 0xb25   :  { %4123 = verf.f32 %v1704_v40 }
 0xb30   :  { %v4122_v37 = vpop.eup %4121 }
 0xb31   :  { %v1709_v23 = vadd.f32 1.0, %v4122_v37 }
 0xb32   :  { %v4124_v51 = vpop.eup %4123 }
 0xb33   :  { %v1708_v17 = vadd.f32 1.0, %v4124_v51  ;;  %v1711_v14 = vmul.f32 %v1709_v23, %v1703_v62 }
 0xb35   :  { %v1710_v46 = vmul.f32 %v1708_v17, %v1702_v55 }
 0xb37   :  { %3928 = vmatprep.mubr.msk.f32.mxu1 %vm1718_vm4, %v1710_v46 }
 0xb38   :  { %3929 = vmatmul.mubr.msk.f32.vlgmr.msra.gmra.mxu1 %vm1718_vm4, %v1711_v14  ;;  %v4828_v14 = vld [vmem:[%s5105_s15] ss:$0 sm:$0xff] }
 0xb39   :  { %3954 = vmatpush3.msra.mxu1 %v4350_v6 }
 0xb3a   :  { %3955 = vmatprep.subr.mxu1 %v4357_v7 }
 0xb3b   :  { %3956 = vmatpush3.msra.mxu1 %v4357_v7 }
 0xb3c   :  { %3957 = vmatprep.subr.mxu1 %v4366_v8 }
 0xb3d   :  { %3958 = vmatpush3.msra.mxu1 %v4366_v8 }
 0xb3e   :  { %3959 = vmatprep.subr.mxu1 %v4375_v9 }
 0xb3f   :  { %3960 = vmatpush3.msra.mxu1 %v4375_v9 }
 0xb40   :  { %3975 = vmatprep.subr.mxu1 %v4388_v10 }
 0xbf8   :  { %v3930_v6 = vpop.f32.mrf.mxu1 }
 0xbf9   :  { %v1797_v25 = vadd.f32 %v3930_v6, %v4828_v14 }
 0xbfa   :  { %v1791_v2 = vpop.f32.mrf.mxu1 }
 0xbfb   :  { %v1792_v7 = vadd.f32 %v4828_v14, %v1791_v2  ;;  %v1801_v26 = vadd.f32 %v1797_v25, %v4739_v61 }
 0xbfd   :  { %v1805_v8 = vsel %vm134_vm0, %v1801_v26, 0.0  ;;  %v1800_v36 = vadd.f32 %v1792_v7, %v4699_v48 }
 0xbfe   :  { %1806 = vadd.xlane.f32.xlu1 %v1805_v8 }
 0xbff   :  { %v1802_v9 = vsel %vm134_vm0, %v1800_v36, 0.0 }
 0xc00   :  { %1803 = vadd.xlane.f32.xlu0 %v1802_v9 }
 0xc87   :  { %v1807_v39 = vpop.xlane.xlu1 %1806 }
 0xc88   :  { %v1809_v40 = vmul.f32 0.03125, %v1807_v39 }
 0xc89   :  { %v1804_v37 = vpop.xlane.xlu0 %1803 }
 0xc8a   :  { %v1811_v51 = vsub.f32 %v1801_v26, %v1809_v40  ;;  %v1808_v23 = vmul.f32 0.03125, %v1804_v37  ;;  %v4841_v26 = vld [vmem:[%s5106_s16] ss:$0 sm:$0xff]  ;;  %s4203_s16 = smov [#allocation4]  }
 0xc8c   :  { %v1810_v55 = vsub.f32 %v1800_v36, %v1808_v23  ;;  %v1813_v17 = vmul.f32 %v1811_v51, %v1811_v51  ;;  %v4847_v23 = vld [vmem:[%s5107_s17] ss:$0 sm:$0xff]  ;;  %s3497_s17 = sshll.u32 %s4203_s16, 4  ;;  %s3498_s17 = int_to_ptr.vmem [resolvable:$true] %s3497_s17 }
 0xc8d   :  { %s4157_s6 = scalar_lea.vmem %s3498_s17, 1024  ;;  %p4162_p1 = scmp.lt.s32.totalorder %s3498_s17, %s3498_s17 }
 0xc8e   :  { %v1817_v62 = vsel %vm134_vm0, %v1813_v17, 0.0  ;;  %v1812_v46 = vmul.f32 %v1810_v55, %v1810_v55  ;;  %p4158_p0 = scmp.ne.s32.totalorder %s3498_s17, %s4157_s6  ;;  %p4163_p2 = scmp.lt.s32.totalorder %s4157_s6, %s4157_s6 }
 0xc8f   :  { %1818 = vadd.xlane.f32.xlu1 %v1817_v62 }
 0xc90   :  { %v1814_v61 = vsel %vm134_vm0, %v1812_v46, 0.0  ;;  %p4164_p3 = por %p4163_p2, %p4162_p1 }
 0xc91   :  { %1815 = vadd.xlane.f32.xlu0 %v1814_v61 }
 0xc92   :  { %p4165_p4 = pnand %p4164_p3, %p4158_p0 }
 0xd18   :  { %v1819_v6 = vpop.xlane.xlu1 %1818 }
 0xd19   :  { %v1821_v48 = vmul.f32 0.03125, %v1819_v6 }
 0xd1a   :  { %v1816_v25 = vpop.xlane.xlu0 %1815 }
 0xd1b   :  { %v1823_v2 = vadd.f32 1e-12, %v1821_v48  ;;  %v1820_v7 = vmul.f32 0.03125, %v1816_v25 }
 0xd1d   :  { %4125 = vrsqrt.f32 %v1823_v2  ;;  %v1822_v8 = vadd.f32 1e-12, %v1820_v7 }
 0xd1f   :  { %4127 = vrsqrt.f32 %v1822_v8 }
 0xd2a   :  { %v4126_v9 = vpop.eup %4125 }
 0xd2b   :  { %v1827_v36 = vmul.f32 %v4126_v9, %v1811_v51 }
 0xd2c   :  { %v4128_v39 = vpop.eup %4127 }
 0xd2d   :  { %v1826_v40 = vmul.f32 %v4128_v39, %v1810_v55  ;;  %v1835_v37 = vmul.f32 %v4841_v26, %v1827_v36 }
 0xd2f   :  { %v1834_v17 = vmul.f32 %v4841_v26, %v1826_v40  ;;  %v4854_v46 = vadd.f32 %v4847_v23, %v1835_v37 }
 0xd31   :  { %v4851_v62 = vadd.f32 %v4847_v23, %v1834_v17 }
 0xd33   :  { %3939 = vmatprep.mubr.msk.f32.mxu0 %vm134_vm0, %v4851_v62  ;;  %3961 = vmatprep.mubr.msk.f32.mxu1 %vm134_vm0, %v4851_v62 }
 0xd34   :  { %3940 = vmatmul.mubr.msk.f32.vlgmr.msra.gmra.mxu0 %vm134_vm0, %v4854_v46  ;;  %3962 = vmatmul.mubr.msk.f32.vlgmr.msra.gmra.mxu1 %vm134_vm0, %v4854_v46 }
 0xd35   :  { %3943 = vmatpush3.msra.mxu0 %v4451_v27  ;;  %3976 = vmatpush3.msra.mxu1 %v4388_v10  ;;  %v5124_v10 = vmov 0.0  }
 0xd36   :  { %3944 = vmatprep.subr.mxu0 %v4456_v28  ;;  %3950 = vmatprep.mubr.msk.f32.mxu0 %vm134_vm0, %v4851_v62 }
 0xd37   :  { %3977 = vmatprep.subr.mxu1 %v4395_v11  ;;  %3983 = vmatprep.mubr.msk.f32.mxu1 %vm134_vm0, %v4851_v62 }
 0xd38   :  { %3945 = vmatpush3.msra.mxu0 %v4456_v28  ;;  %3978 = vmatpush3.msra.mxu1 %v4395_v11 }
 0xd39   :  { %3946 = vmatprep.subr.mxu0 %v4463_v29  ;;  %3979 = vmatprep.subr.mxu1 %v4400_v12 }
 0xd3a   :  { %3947 = vmatpush3.msra.mxu0 %v4463_v29  ;;  %3980 = vmatpush3.msra.mxu1 %v4400_v12 }
 0xd3b   :  { %3948 = vmatprep.subr.mxu0 %v4470_v30  ;;  %3981 = vmatprep.subr.mxu1 %v4409_v13 }
 0xd3c   :  { %3949 = vmatpush3.msra.mxu0 %v4470_v30  ;;  %3982 = vmatpush3.msra.mxu1 %v4409_v13 }
 0xd3d   :  { %3951 = vmatmul.mubr.msk.f32.vlgmr.msra.gmra.mxu0 %vm134_vm0, %v4854_v46  ;;  %3964 = vmatprep.subr.mxu0 %v4477_v31 }
 0xd3e   :  { %3984 = vmatmul.mubr.msk.f32.vlgmr.msra.gmra.mxu1 %vm134_vm0, %v4854_v46  ;;  %3965 = vmatpush3.msra.mxu0 %v4477_v31 }
 0xd3f   :  { %3972 = vmatprep.mubr.msk.f32.mxu0 %vm134_vm0, %v4851_v62  ;;  %3966 = vmatprep.subr.mxu0 %v4484_v32 }
 0xd40   :  { %3967 = vmatpush3.msra.mxu0 %v4484_v32  ;;  %3997 = vmatprep.subr.mxu1 %v5124_v10 }
 0xd41   :  { %3968 = vmatprep.subr.mxu0 %v4493_v33  ;;  %3999 = vmatprep.mubr.msk.f32.mxu1 %vm4202_vm1, %v5124_v10 }
 0xd42   :  { %3969 = vmatpush3.msra.mxu0 %v4493_v33 }
 0xd43   :  { %3970 = vmatprep.subr.mxu0 %v4502_v34 }
 0xd44   :  { %3971 = vmatpush3.msra.mxu0 %v4502_v34 }
 0xd45   :  { %3973 = vmatmul.mubr.msk.f32.vlgmr.msra.gmra.mxu0 %vm134_vm0, %v4854_v46  ;;  %3986 = vmatprep.subr.mxu0 %v4548_v56 }
 0xd46   :  { %3987 = vmatpush3.msra.mxu0 %v4548_v56  ;;  %3994 = vmatprep.mubr.msk.f32.mxu0 %vm134_vm0, %v4851_v62 }
 0xd47   :  { %3988 = vmatprep.subr.mxu0 %v4553_v57 }
 0xd48   :  { %3989 = vmatpush3.msra.mxu0 %v4553_v57 }
 0xd49   :  { %3990 = vmatprep.subr.mxu0 %v4560_v58 }
 0xd4a   :  { %3991 = vmatpush3.msra.mxu0 %v4560_v58 }
 0xd4b   :  { %3992 = vmatprep.subr.mxu0 %v4567_v59 }
 0xd4c   :  { %3993 = vmatpush3.msra.mxu0 %v4567_v59 }
 0xd4d   :  { %3995 = vmatmul.mubr.msk.f32.vlgmr.msra.gmra.mxu0 %vm134_vm0, %v4854_v46  ;;  %4007 = vmatprep.subr.mxu0 %v5124_v10 }
 0xd4e   :  { %4009 = vmatprep.mubr.msk.f32.mxu0 %vm4202_vm1, %v5124_v10 }
 0xdf4   :  { %v4916_v11 = vpop.f32.mrf.mxu0  ;;  %v4918_v12 = vpop.f32.mrf.mxu1 }
 0xdf6   :  { %v2066_v13 = vpop.f32.mrf.mxu1  ;;  %v1916_v27 = vpop.f32.mrf.mxu0 }
 0xdf7   :  { %v2067_v28 = vadd.f32 %v4425_v18, %v2066_v13  ;;  %v1917_v29 = vadd.f32 %v4430_v20, %v1916_v27 }
 0xdf9   :  { %3998 = vmatpush3.xpose.msk.msra.mxu1 %vm621_vm2, %v2067_v28 }
 0xdfa   :  { %4002 = vmatprep.subr.mxu1 %v5124_v10 }
 0xdfc   :  { %4000 = vmatmul.mubr.msk.f32.vlgmr.msra.gmra.mxu1 %vm621_vm2, %v1917_v29 }
 0xdfd   :  { %4004 = vmatprep.mubr.msk.f32.mxu1 %vm4202_vm1, %v5124_v10  ;;  %v4929_v31 = vpop.f32.mrf.mxu0 }
 0xdfe   :  { %v4927_v30 = vpop.f32.mrf.mxu1 }
 0xdff   :  { %v1991_v34 = vpop.f32.mrf.mxu0 }
 0xe00   :  { %v2216_v32 = vpop.f32.mrf.mxu1  ;;  %v1992_v59 = vadd.f32 %v4533_v54, %v1991_v34 }
 0xe01   :  { %v2217_v33 = vadd.f32 %v4444_v24, %v2216_v32 }
 0xe03   :  { %4003 = vmatpush3.msra.mxu1 %v2217_v33 }
 0xe04   :  { %4012 = vmatprep.subr.mxu1 %v5124_v10 }
 0xe05   :  { %v4933_v56 = vpop.f32.mrf.mxu0 }
 0xe07   :  { %v2141_v57 = vpop.f32.mrf.mxu0 }
 0xe08   :  { %v2142_v58 = vadd.f32 %v4527_v49, %v2141_v57 }
 0xe0a   :  { %4008 = vmatpush3.xpose.msk.msra.mxu0 %vm621_vm2, %v2142_v58 }
 0xe0b   :  { %4017 = vmatprep.subr.mxu0 %v5124_v10 }
 0xe0d   :  { %4010 = vmatmul.mubr.msk.f32.vlgmr.msra.gmra.mxu0 %vm621_vm2, %v1992_v59  ;;  %v4948_v48 = vpop.f32.mrf.mxu0 }
 0xe0e   :  { %4018 = vmatpush3.msra.mxu0 %v4593_v41  ;;  %4021 = vmatprep.mubr.msk.f32.mxu0 %vm4202_vm1, %v5124_v10 }
 0xe0f   :  { %4019 = vmatprep.subr.mxu0 %v5124_v10  ;;  %v2291_v25 = vpop.f32.mrf.mxu0 }
 0xe10   :  { %4020 = vmatpush3.msra.mxu0 %v4598_v42  ;;  %v2292_v57 = vadd.f32 %v4586_v38, %v2291_v25  ;;  %v2072_v25 = vadd.f32 %v4918_v12, %v4425_v18  ;;  %v1997_v18 = vadd.f32 %v4929_v31, %v4533_v54 }
 0xe11   :  { %4031 = vmatprep.subr.mxu0 %v5124_v10 }
 0xebc   :  { %v2372_v51 = vpop.f32.mrf.mxu1 }
 0xebd   :  { %v2373_v55 = vadd.f32 %v2372_v51, %v4515_v35 }
 0xebe   :  { %v4001_v61 = vpop.f32.mrf.mxu1 }
 0xebf   :  { %v2376_v6 = vsel %vm698_vm3, %v2373_v55, -inf }
 0xec0   :  { %2377 = vmax.xlane.f32.xlu0 %v2376_v6 }
 0xecd   :  { %v2534_v2 = vpop.f32.mrf.mxu0 }
 0xece   :  { %v2535_v7 = vadd.f32 %v2534_v2, %v4515_v35 }
 0xecf   :  { %v4011_v8 = vpop.f32.mrf.mxu0 }
 0xed0   :  { %v2538_v9 = vsel %vm698_vm3, %v2535_v7, -inf }
 0xed1   :  { %2539 = vmax.xlane.f32.xlu1 %v2538_v9 }
 0xf49   :  { %v2378_v36 = vpop.xlane.xlu0 %2377 }
 0xf4a   :  { %v2379_v39 = vsub.f32 %v2373_v55, %v2378_v36  ;;  %v2222_v55 = vadd.f32 %v4927_v30, %v4444_v24  ;;  %v1922_v24 = vadd.f32 %v4916_v11, %v4430_v20  ;;  %v2147_v30 = vadd.f32 %v4933_v56, %v4527_v49 }
 0xf4c   :  { %v2380_v40 = vmul.f32 1.442695, %v2379_v39 }
 0xf4e   :  { %4129 = vpow2.f32 %v2380_v40 }
 0xf5a   :  { %v2540_v37 = vpop.xlane.xlu1 %2539 }
 0xf5b   :  { %v4130_v17 = vpop.eup %4129  ;;  %v2541_v13 = vsub.f32 %v2535_v7, %v2540_v37 }
 0xf5c   :  { %v2382_v27 = vsel %vm698_vm3, %v4130_v17, 0.0 }
 0xf5d   :  { %v2542_v28 = vmul.f32 1.442695, %v2541_v13  ;;  %2383 = vadd.xlane.f32.xlu0 %v2382_v27 }
 0xf5f   :  { %4131 = vpow2.f32 %v2542_v28 }
 0xf6c   :  { %v4132_v29 = vpop.eup %4131 }
 0xf6d   :  { %v2544_v32 = vsel %vm698_vm3, %v4132_v29, 0.0 }
 0xf6e   :  { %2545 = vadd.xlane.f32.xlu1 %v2544_v32 }
 0xfe6   :  { %v2384_v35 = vpop.xlane.xlu0 %2383 }
 0xfe7   :  { %4133 = vrcp.f32 %v2384_v35 }
 0xff4   :  { %v4134_v33 = vpop.eup %4133 }
 0xff5   :  { %v2386_v34 = vmul.f32 %v4134_v33, %v4130_v17 }
 0xff7   :  { %v2546_v58 = vpop.xlane.xlu1 %2545  ;;  %2388 = vst.msk [vmem:[#allocation4 + $0x20] sm:$0xff] %vm698_vm3, %v2386_v34  ;;  %4005 = vmatmul.mubr.msk.f32.vlgmr.msra.gmra.mxu1 %vm698_vm3, %v2386_v34 }
 0xff8   :  { %4135 = vrcp.f32 %v2546_v58  ;;  %4013 = vmatpush3.msra.mxu1 %v2292_v57  ;;  %4014 = vmatprep.mubr.msk.f32.mxu1 %vm4202_vm1, %v5124_v10 }
 0xff9   :  { %4024 = vmatprep.subr.mxu1 %v5124_v10 }
0x1005   :  { %v4136_v59 = vpop.eup %4135 }
0x1006   :  { %v2548_v51 = vmul.f32 %v4136_v59, %v4132_v29 }
0x1008   :  { %2550 = vst.msk [vmem:[#allocation4 + $0x28] sm:$0xff] %vm698_vm3, %v2548_v51  ;;  %4015 = vmatmul.mubr.msk.f32.vlgmr.msra.gmra.mxu1 %vm698_vm3, %v2548_v51 }
0x1009   :  { %4025 = vmatpush3.msra.mxu1 %v4607_v47  ;;  %4028 = vmatprep.mubr.msk.f32.mxu1 %vm4202_vm1, %v5124_v10 }
0x100a   :  { %4026 = vmatprep.subr.mxu1 %v5124_v10 }
0x100b   :  { %4027 = vmatpush3.msra.mxu1 %v4614_v50 }
0x100c   :  { %4036 = vmatprep.subr.mxu1 %v5124_v10 }
0x10b7   :  { %v2458_v61 = vpop.f32.mrf.mxu1 }
0x10b8   :  { %4029 = vmatmul.mubr.msk.f32.vlgmr.msra.gmra.mxu1 %vm621_vm2, %v2458_v61 }
0x10b9   :  { %4037 = vmatpush3.msra.mxu1 %v2222_v55  ;;  %v4006_v6 = vpop.f32.mrf.mxu1  ;;  %4038 = vmatprep.mubr.msk.f32.mxu1 %vm4202_vm1, %v5124_v10 }
0x10ba   :  { %4046 = vmatprep.subr.mxu1 %v5124_v10 }
0x10c8   :  { %v2620_v2 = vpop.f32.mrf.mxu1 }
0x10c9   :  { %4022 = vmatmul.mubr.msk.f32.vlgmr.msra.gmra.mxu0 %vm621_vm2, %v2620_v2 }
0x10ca   :  { %4032 = vmatpush3.xpose.msk.msra.mxu0 %vm621_vm2, %v2072_v25  ;;  %v4016_v7 = vpop.f32.mrf.mxu1  ;;  %4033 = vmatprep.mubr.msk.f32.mxu0 %vm4202_vm1, %v5124_v10 }
0x10cb   :  { %4041 = vmatprep.subr.mxu0 %v5124_v10  ;;  %v2297_v7 = vadd.f32 %v4948_v48, %v4586_v38 }
0x10cd   :  { %4034 = vmatmul.mubr.msk.f32.vlgmr.msra.gmra.mxu0 %vm621_vm2, %v1922_v24 }
0x10ce   :  { %4042 = vmatpush3.xpose.msk.msra.mxu0 %vm621_vm2, %v2147_v30  ;;  %4043 = vmatprep.mubr.msk.f32.mxu0 %vm4202_vm1, %v5124_v10 }
0x10cf   :  { %4051 = vmatprep.subr.mxu0 %v5124_v10 }
0x10d1   :  { %4044 = vmatmul.mubr.msk.f32.vlgmr.msra.gmra.mxu0 %vm621_vm2, %v1997_v18 }
0x10d2   :  { %4052 = vmatpush3.msra.mxu0 %v4593_v41  ;;  %4055 = vmatprep.mubr.msk.f32.mxu0 %vm4202_vm1, %v5124_v10 }
0x10d3   :  { %4053 = vmatprep.subr.mxu0 %v5124_v10 }
0x10d4   :  { %4054 = vmatpush3.msra.mxu0 %v4598_v42 }
0x10d5   :  { %4065 = vmatprep.subr.mxu0 %v4711_v43 }
0x1178   :  { %v2766_v20 = vpop.f32.mrf.mxu1 }
0x117a   :  { %v4030_v49 = vpop.f32.mrf.mxu1 }
0x1189   :  { %v2693_v11 = vpop.f32.mrf.mxu0 }
0x118a   :  { %v2767_v12 = vadd.f32 %v2766_v20, %v2693_v11 }
0x118b   :  { %v4023_v54 = vpop.f32.mrf.mxu0 }
0x118c   :  { %v3240_v29 = vadd.f32 %v4664_v53, %v2767_v12 }
0x118d   :  { %v2842_v31 = vpop.f32.mrf.mxu0 }
0x118e   :  { %v2843_v56 = vadd.f32 %v4655_v63, %v2842_v31  ;;  %v3242_v33 = vadd.f32 %v3240_v29, %v4851_v62 }
0x118f   :  { %v4035_v8 = vpop.f32.mrf.mxu0 }
0x1190   :  { %v2846_v41 = vsel %vm698_vm3, %v2843_v56, -inf  ;;  %v3244_v57 = vsel %vm134_vm0, %v3242_v33, 0.0 }
0x1191   :  { %2847 = vmax.xlane.f32.xlu0 %v2846_v41  ;;  %v3004_v9 = vpop.f32.mrf.mxu0 }
0x1192   :  { %v3005_v36 = vadd.f32 %v4655_v63, %v3004_v9 }
0x1193   :  { %v4045_v39 = vpop.f32.mrf.mxu0 }
0x1194   :  { %v3008_v42 = vsel %vm698_vm3, %v3005_v36, -inf }
0x1195   :  { %3009 = vmax.xlane.f32.xlu1 %v3008_v42 }
0x121a   :  { %v2848_v40 = vpop.xlane.xlu0 %2847 }
0x121b   :  { %v2849_v37 = vsub.f32 %v2843_v56, %v2848_v40 }
0x121d   :  { %v2850_v17 = vmul.f32 1.442695, %v2849_v37 }
0x121e   :  { %v3010_v13 = vpop.xlane.xlu1 %3009 }
0x121f   :  { %4137 = vpow2.f32 %v2850_v17  ;;  %v3011_v27 = vsub.f32 %v3005_v36, %v3010_v13 }
0x1221   :  { %v3012_v28 = vmul.f32 1.442695, %v3011_v27 }
0x1223   :  { %4139 = vpow2.f32 %v3012_v28 }
0x122c   :  { %v4138_v32 = vpop.eup %4137 }
0x122d   :  { %v2852_v35 = vsel %vm698_vm3, %v4138_v32, 0.0 }
0x122e   :  { %2853 = vadd.xlane.f32.xlu0 %v2852_v35 }
0x1230   :  { %v4140_v63 = vpop.eup %4139 }
0x1231   :  { %v3014_v34 = vsel %vm698_vm3, %v4140_v63, 0.0 }
0x1232   :  { %3015 = vadd.xlane.f32.xlu1 %v3014_v34  ;;  %3245 = vadd.xlane.f32.xlu0 %v3244_v57 }
0x12b7   :  { %v2854_v58 = vpop.xlane.xlu0 %2853 }
0x12b8   :  { %4141 = vrcp.f32 %v2854_v58 }
0x12bb   :  { %v3016_v59 = vpop.xlane.xlu1 %3015  ;;  %v3246_v51 = vpop.xlane.xlu0 %3245 }
0x12bc   :  { %4143 = vrcp.f32 %v3016_v59  ;;  %v3250_v55 = vmul.f32 0.03125, %v3246_v51 }
0x12be   :  { %v3252_v61 = vsub.f32 %v3242_v33, %v3250_v55 }
0x12c0   :  { %v3254_v6 = vmul.f32 %v3252_v61, %v3252_v61 }
0x12c2   :  { %v3256_v25 = vsel %vm134_vm0, %v3254_v6, 0.0 }
0x12c3   :  { %3257 = vadd.xlane.f32.xlu0 %v3256_v25 }
0x12c5   :  { %v4142_v62 = vpop.eup %4141 }
0x12c6   :  { %v2856_v2 = vmul.f32 %v4142_v62, %v4138_v32 }
0x12c8   :  { %2858 = vst.msk [vmem:[#allocation4 + $0x30] sm:$0xff] %vm698_vm3, %v2856_v2  ;;  %4039 = vmatmul.mubr.msk.f32.vlgmr.msra.gmra.mxu1 %vm698_vm3, %v2856_v2 }
0x12c9   :  { %v4144_v24 = vpop.eup %4143  ;;  %4047 = vmatpush3.msra.mxu1 %v2297_v7  ;;  %4048 = vmatprep.mubr.msk.f32.mxu1 %vm4202_vm1, %v5124_v10 }
0x12ca   :  { %v3018_v30 = vmul.f32 %v4144_v24, %v4140_v63  ;;  %4058 = vmatprep.subr.mxu1 %v5124_v10 }
0x12cc   :  { %3020 = vst.msk [vmem:[#allocation4 + $0x38] sm:$0xff] %vm698_vm3, %v3018_v30  ;;  %4049 = vmatmul.mubr.msk.f32.vlgmr.msra.gmra.mxu1 %vm698_vm3, %v3018_v30 }
0x12cd   :  { %4059 = vmatpush3.msra.mxu1 %v4607_v47  ;;  %4062 = vmatprep.mubr.msk.f32.mxu1 %vm4202_vm1, %v5124_v10 }
0x12ce   :  { %4060 = vmatprep.subr.mxu1 %v5124_v10 }
0x12cf   :  { %4061 = vmatpush3.msra.mxu1 %v4614_v50 }
0x12d0   :  { %4076 = vmatprep.subr.mxu1 %v4754_v15 }
0x134c   :  { %v3258_v38 = vpop.xlane.xlu0 %3257 }
0x134d   :  { %v3262_v48 = vmul.f32 0.03125, %v3258_v38 }
0x134f   :  { %v3264_v18 = vadd.f32 1e-12, %v3262_v48 }
0x1351   :  { %4145 = vrsqrt.f32 %v3264_v18 }
0x135e   :  { %v4146_v20 = vpop.eup %4145 }
0x135f   :  { %v3268_v49 = vmul.f32 %v4146_v20, %v3252_v61 }
0x1361   :  { %v3270_v12 = vmul.f32 %v4689_v52, %v3268_v49 }
0x1363   :  { %v5029_v50 = vadd.f32 %v4696_v60, %v3270_v12 }
0x1388   :  { %v2928_v11 = vpop.f32.mrf.mxu1 }
0x1389   :  { %4063 = vmatmul.mubr.msk.f32.vlgmr.msra.gmra.mxu1 %vm621_vm2, %v2928_v11 }
0x138a   :  { %v4040_v47 = vpop.f32.mrf.mxu1  ;;  %4077 = vmatpush3.msra.mxu1 %v4754_v15 }
0x138b   :  { %4078 = vmatprep.subr.mxu1 %v4761_v0 }
0x138c   :  { %v3090_v10 = vpop.f32.mrf.mxu1  ;;  %4079 = vmatpush3.msra.mxu1 %v4761_v0 }
0x138d   :  { %4056 = vmatmul.mubr.msk.f32.vlgmr.msra.gmra.mxu0 %vm621_vm2, %v3090_v10  ;;  %4080 = vmatprep.subr.mxu1 %v4768_v1 }
0x138e   :  { %v4050_v54 = vpop.f32.mrf.mxu1  ;;  %4073 = vmatprep.mubr.msk.f32.mxu0 %vm134_vm0, %v5029_v50  ;;  %4066 = vmatpush3.msra.mxu0 %v4711_v43 }
0x138f   :  { %4067 = vmatprep.subr.mxu0 %v4718_v5  ;;  %4081 = vmatpush3.msra.mxu1 %v4768_v1 }
0x1390   :  { %4068 = vmatpush3.msra.mxu0 %v4718_v5  ;;  %4082 = vmatprep.subr.mxu1 %v4775_v3 }
0x1391   :  { %4069 = vmatprep.subr.mxu0 %v4723_v44  ;;  %4083 = vmatpush3.msra.mxu1 %v4775_v3 }
0x1392   :  { %4070 = vmatpush3.msra.mxu0 %v4723_v44  ;;  %4084 = vmatprep.subr.mxu1 %v4782_v4 }
0x1393   :  { %4071 = vmatprep.subr.mxu0 %v4730_v45  ;;  %4085 = vmatpush3.msra.mxu1 %v4782_v4 }
0x1394   :  { %4072 = vmatpush3.msra.mxu0 %v4730_v45  ;;  %4086 = vmatprep.subr.mxu1 %v4789_v16 }
0x1395   :  { %4087 = vmatpush3.msra.mxu1 %v4789_v16 }
0x1396   :  { %4088 = vmatprep.subr.mxu1 %v4796_v19 }
0x1397   :  { %4089 = vmatpush3.msra.mxu1 %v4796_v19 }
0x1398   :  { %4090 = vmatprep.subr.mxu1 %v4802_v21 }
0x1399   :  { %4091 = vmatpush3.msra.mxu1 %v4802_v21 }
0x1449   :  { %v3236_v43 = vpop.f32.mrf.mxu1 }
0x144b   :  { %v4064_v5 = vpop.f32.mrf.mxu1 }
0x144d   :  { %v3163_v44 = vpop.f32.mrf.mxu0 }
0x144e   :  { %v3237_v15 = vadd.f32 %v3236_v43, %v3163_v44 }
0x144f   :  { %v4057_v0 = vpop.f32.mrf.mxu0 }
0x1450   :  { %v3241_v1 = vadd.f32 %v4664_v53, %v3237_v15 }
0x1452   :  { %v3243_v45 = vadd.f32 %v3241_v1, %v4854_v46 }
0x1454   :  { %v3247_v3 = vsel %vm134_vm0, %v3243_v45, 0.0 }
0x1455   :  { %3248 = vadd.xlane.f32.xlu1 %v3247_v3 }
0x14de   :  { %v3249_v4 = vpop.xlane.xlu1 %3248 }
0x14df   :  { %v3251_v16 = vmul.f32 0.03125, %v3249_v4 }
0x14e1   :  { %v3253_v31 = vsub.f32 %v3243_v45, %v3251_v16 }
0x14e3   :  { %v3255_v19 = vmul.f32 %v3253_v31, %v3253_v31 }
0x14e5   :  { %v3259_v56 = vsel %vm134_vm0, %v3255_v19, 0.0 }
0x14e6   :  { %3260 = vadd.xlane.f32.xlu1 %v3259_v56 }
0x156f   :  { %v3261_v21 = vpop.xlane.xlu1 %3260 }
0x1570   :  { %v3263_v8 = vmul.f32 0.03125, %v3261_v21 }
0x1572   :  { %v3265_v41 = vadd.f32 1e-12, %v3263_v8 }
0x1574   :  { %4147 = vrsqrt.f32 %v3265_v41 }
0x1581   :  { %v4148_v9 = vpop.eup %4147 }
0x1582   :  { %v3269_v36 = vmul.f32 %v4148_v9, %v3253_v31 }
0x1584   :  { %v3271_v53 = vmul.f32 %v4689_v52, %v3269_v36 }
0x1586   :  { %v3273_v46 = vadd.f32 %v4696_v60, %v3271_v53 }
0x1588   :  { %4074 = vmatmul.mubr.msk.f32.vlgmr.msra.gmra.mxu0 %vm134_vm0, %v3273_v46 }
0x1648   :  { %v4075_v39 = vpop.f32.mrf.mxu0 }
0x1649   :  { %v3352_v42 = vadd.f32 %v4075_v39, %v4811_v22 }
0x164a   :  { %v3346_v40 = vpop.f32.mrf.mxu0 }
0x164b   :  { %v3358_v37 = vmul.f32 0.70710677, %v3352_v42  ;;  %v3347_v17 = vadd.f32 %v4811_v22, %v3346_v40  ;;  %v3356_v52 = vmul.f32 0.5, %v3352_v42 }
0x164d   :  { %4149 = verf.f32 %v3358_v37  ;;  %v3357_v13 = vmul.f32 0.70710677, %v3347_v17  ;;  %v3355_v32 = vmul.f32 0.5, %v3347_v17 }
0x164f   :  { %4151 = verf.f32 %v3357_v13 }
0x165a   :  { %v4150_v27 = vpop.eup %4149 }
0x165b   :  { %v3362_v29 = vadd.f32 1.0, %v4150_v27 }
0x165c   :  { %v4152_v28 = vpop.eup %4151 }
0x165d   :  { %v3361_v35 = vadd.f32 1.0, %v4152_v28  ;;  %v3364_v60 = vmul.f32 %v3362_v29, %v3356_v52 }
0x165f   :  { %v3363_v33 = vmul.f32 %v3361_v35, %v3355_v32 }
0x1661   :  { %4092 = vmatprep.mubr.msk.f32.mxu1 %vm1718_vm4, %v3363_v33 }
0x1662   :  { %4093 = vmatmul.mubr.msk.f32.vlgmr.msra.gmra.mxu1 %vm1718_vm4, %v3364_v60 }
0x1722   :  { %v4094_v63 = vpop.f32.mrf.mxu1 }
0x1723   :  { %v3443_v34 = vadd.f32 %v4094_v63, %v4828_v14 }
0x1724   :  { %v3437_v57 = vpop.f32.mrf.mxu1 }
0x1725   :  { %v3438_v22 = vadd.f32 %v4828_v14, %v3437_v57  ;;  %v3447_v58 = vadd.f32 %v3443_v34, %v3273_v46 }
0x1727   :  { %v3451_v59 = vsel %vm134_vm0, %v3447_v58, 0.0  ;;  %v3446_v51 = vadd.f32 %v3438_v22, %v5029_v50 }
0x1728   :  { %3452 = vadd.xlane.f32.xlu1 %v3451_v59 }
0x1729   :  { %v3448_v55 = vsel %vm134_vm0, %v3446_v51, 0.0 }
0x172a   :  { %3449 = vadd.xlane.f32.xlu0 %v3448_v55 }
0x17b1   :  { %v3453_v61 = vpop.xlane.xlu1 %3452 }
0x17b2   :  { %v3455_v6 = vmul.f32 0.03125, %v3453_v61 }
0x17b3   :  { %v3450_v25 = vpop.xlane.xlu0 %3449 }
0x17b4   :  { %v3457_v62 = vsub.f32 %v3447_v58, %v3455_v6  ;;  %v3454_v2 = vmul.f32 0.03125, %v3450_v25 }
0x17b6   :  { %v3456_v7 = vsub.f32 %v3446_v51, %v3454_v2  ;;  %v3459_v24 = vmul.f32 %v3457_v62, %v3457_v62 }
0x17b8   :  { %v3463_v30 = vsel %vm134_vm0, %v3459_v24, 0.0  ;;  %v3458_v38 = vmul.f32 %v3456_v7, %v3456_v7 }
0x17b9   :  { %3464 = vadd.xlane.f32.xlu1 %v3463_v30 }
0x17ba   :  { %v3460_v14 = vsel %vm134_vm0, %v3458_v38, 0.0 }
0x17bb   :  { %3461 = vadd.xlane.f32.xlu0 %v3460_v14 }
0x17bc   :  { %4168 = shalt.err (!%p4165_p4)
}
0x17bd   :  { %s4204_s25 = smov 128   ;;  %s4205_s3 = smov 8  }
0x17be   :  { %3503 = dma.vmem_to_hbm [thread:$0]  %s3498_s17, 1024, %s5109_s19, [#allocation5], %s4204_s25, %s4204_s25, %s4205_s3  }
0x17bf   :  { %s4206_s27 = smov [#allocation2]  }
0x17c0   :  { %s3485_s4 = sshll.u32 %s4206_s27, 4  ;;  %s3486_s4 = int_to_ptr.vmem [resolvable:$true] %s3485_s4 }
0x17c1   :  { %s4177_s19 = scalar_lea.vmem %s3486_s4, 256  ;;  %p4182_p6 = scmp.lt.s32.totalorder %s3486_s4, %s3486_s4 }
0x17c2   :  { %p4178_p5 = scmp.ne.s32.totalorder %s3486_s4, %s4177_s19  ;;  %p4183_p7 = scmp.lt.s32.totalorder %s4177_s19, %s4177_s19 }
0x17c4   :  { %p4184_p8 = por %p4183_p7, %p4182_p6 }
0x17c6   :  { %p4185_p9 = pnand %p4184_p8, %p4178_p5 }
0x1842   :  { %v3465_v48 = vpop.xlane.xlu1 %3464 }
0x1843   :  { %v3467_v18 = vmul.f32 0.03125, %v3465_v48 }
0x1844   :  { %v3462_v20 = vpop.xlane.xlu0 %3461 }
0x1845   :  { %v3469_v49 = vadd.f32 1e-12, %v3467_v18  ;;  %v3466_v11 = vmul.f32 0.03125, %v3462_v20 }
0x1847   :  { %4153 = vrsqrt.f32 %v3469_v49  ;;  %v3468_v12 = vadd.f32 1e-12, %v3466_v11 }
0x1849   :  { %4155 = vrsqrt.f32 %v3468_v12 }
0x1854   :  { %v4154_v47 = vpop.eup %4153 }
0x1855   :  { %v3473_v10 = vmul.f32 %v4154_v47, %v3457_v62 }
0x1856   :  { %v4156_v50 = vpop.eup %4155 }
0x1857   :  { %v3472_v54 = vmul.f32 %v4156_v50, %v3456_v7  ;;  %v3475_v43 = vmul.f32 %v4841_v26, %v3473_v10 }
0x1859   :  { %v3474_v5 = vmul.f32 %v4841_v26, %v3472_v54  ;;  %v3477_v44 = vadd.f32 %v4847_v23, %v3475_v43 }
0x185b   :  { %v3476_v15 = vadd.f32 %v4847_v23, %v3474_v5  ;;  %3479 = vst.msk [vmem:[#allocation2 + $0x8] sm:$0xff] %vm134_vm0, %v3477_v44 }
0x185d   :  { %3478 = vst.msk [vmem:[#allocation2] sm:$0xff] %vm134_vm0, %v3476_v15 }
0x185e   :  { %4188 = shalt.err (!%p4185_p9)
}
0x185f   :  { %3491 = dma.vmem_to_hbm [thread:$0]  %s3486_s4, 256, %s5108_s18, [#allocation3], %s4204_s25, %s4204_s25, %s4205_s3  }
0x1860   :  { %4197 = dma.done.wait [#allocation3], 256  }
0x1861   :  { %4198 = vsyncadd [#allocation3], 4294967040 }
0x1862   :  { %4199 = dma.done.wait [#allocation5], 1024  }
0x1863   :  { %4200 = vsyncadd [#allocation5], 4294966272 }
0x1864   :  { %3510 = vsyncpa [#allocation3], 1 }
0x1865   :  { %3511 = vsyncpa [#allocation5], 1 }

</bundles_post_ra>
